<compile_context>
chip_gen: v6e
topology: v6e:2x2x1
jax: 0.10.0
libtpu: 0.0.40
codegen_flags: <defaults>
</compile_context>

<pallas_src>
import functools

import jax
import jax.numpy as jnp
import numpy as np
from jax import lax
from jax.experimental import pallas as pl
from jax.experimental.pallas import tpu as pltpu


# --------------------------------------------------------------------------
# Static conv geometry helpers (taps in kd, kh, kw order; tap = kd*9+kh*3+kw).
# --------------------------------------------------------------------------
def _conv_offsets(H, W):
    """Flat-index offset of each of the 27 taps in the (D*H*W) layout."""
    HW = H * W
    offs = []
    for kd in range(3):
        for kh in range(3):
            for kw in range(3):
                offs.append((kd - 1) * HW + (kh - 1) * W + (kw - 1))
    return tuple(offs)


def _conv_masks(D, H, W):
    """(27, R) 0/1 mask: 1 where the tap's source voxel lies inside the volume
    (implements the conv's zero padding and kills the circular-roll wrap)."""
    R = D * H * W
    r = np.arange(R)
    d, h, w = r // (H * W), (r // W) % H, r % W
    masks = []
    for kd in range(3):
        for kh in range(3):
            for kw in range(3):
                dd, dh, dw = kd - 1, kh - 1, kw - 1
                ok = ((d + dd >= 0) & (d + dd < D) &
                      (h + dh >= 0) & (h + dh < H) &
                      (w + dw >= 0) & (w + dw < W))
                masks.append(ok)
    return np.stack(masks).astype(np.float32)


# --------------------------------------------------------------------------
# In-kernel helpers.
# --------------------------------------------------------------------------
def _im2col_patch(src, mask_ref, patch_ref, offsets, C, R):
    """Fill patch_ref (27*C, R) from src (C, R) with lane-dense tap stores.

    patch[tap*C + c, r] = src[c, r + offset_tap]  (0 outside the volume).
    """
    for tap, off in enumerate(offsets):
        shift = (-off) % R                       # jnp.roll semantics
        rolled = src if shift == 0 else pltpu.roll(src, shift, axis=1)
        patch_ref[tap * C:(tap + 1) * C, :] = (
            rolled * mask_ref[tap, :]).astype(patch_ref.dtype)


def _partial_stats(y, R):
    """(C, 2): per-channel [sum, centered sum-of-squares] from f32 y (C, R)."""
    s = jnp.sum(y, axis=1, keepdims=True)
    mu = s * (1.0 / R)
    d = y - mu
    return jnp.concatenate([s, jnp.sum(d * d, axis=1, keepdims=True)], axis=1)


# --------------------------------------------------------------------------
# Pass A: conv1 (im2col, one MXU matmul) + BN1 partial stats.  Output (C, R).
# --------------------------------------------------------------------------
def _conv1_kernel(x_ref, mask_ref, w_ref, y_ref, stats_ref, patch_ref, *,
                  C, R, offsets):
    x = x_ref[...].astype(jnp.float32)                       # (C, R)
    _im2col_patch(x, mask_ref, patch_ref, offsets, C, R)
    y = jnp.dot(w_ref[...], patch_ref[...],
                preferred_element_type=jnp.float32)          # (C, R) f32
    y_ref[...] = y.astype(y_ref.dtype)
    stats_ref[...] = _partial_stats(y, R)                    # (C, 2)


# --------------------------------------------------------------------------
# Pass B: bn1(affine) + relu -> conv2 (im2col) + BN2 partial stats.
# --------------------------------------------------------------------------
def _bnrelu_conv2_kernel(y1_ref, sc_ref, sh_ref, mask_ref, w_ref,
                         y2_ref, stats_ref, patch_ref, *, C, R, offsets):
    z = jnp.maximum(
        y1_ref[...].astype(jnp.float32) * sc_ref[...] + sh_ref[...], 0.0)
    _im2col_patch(z, mask_ref, patch_ref, offsets, C, R)
    y2 = jnp.dot(w_ref[...], patch_ref[...],
                 preferred_element_type=jnp.float32)
    y2_ref[...] = y2.astype(y2_ref.dtype)
    stats_ref[...] = _partial_stats(y2, R)


# --------------------------------------------------------------------------
# Pass C: bn2(affine) + residual add + relu.  Lane-dense, tiled over R.
# --------------------------------------------------------------------------
def _bn2_residual_relu_kernel(y2_ref, res_ref, sc_ref, sh_ref, o_ref):
    out = (y2_ref[...].astype(jnp.float32) * sc_ref[...] + sh_ref[...]
           + res_ref[...].astype(jnp.float32))
    o_ref[...] = jnp.maximum(out, 0.0).astype(o_ref.dtype)


# --------------------------------------------------------------------------
# Wrapper glue.
# --------------------------------------------------------------------------
def _vmem_limit_bytes():
    cap = 128 * 1024 * 1024
    try:
        info = pltpu.get_tpu_info()
        cap = int(getattr(info, "vmem_capacity_bytes", cap) or cap)
    except Exception:
        pass
    # ~85% of physical: ~54 MiB on v7x (64 MiB), capped at 100 MiB on v5e/v6e.
    return min(int(cap * 0.85), 100 * 1024 * 1024)


def _pick_r_tile(R, cap=16384):
    """Largest multiple-of-128 divisor of R that is <= cap (else full R)."""
    if R <= cap:
        return R
    best = R
    for t in range(128, cap + 1, 128):
        if R % t == 0:
            best = t
    return best


def _combine_bn_stats(stats, R, cnt, gamma, beta, eps):
    """Chan-style combine of per-block (sum, centered SS) -> folded affine."""
    s = stats[:, :, 0]                             # (N, C) block sums
    q = stats[:, :, 1]                             # (N, C) centered SS
    mean_b = s / R
    mean = jnp.sum(s, axis=0) / cnt                # (C,)
    var = (jnp.sum(q, axis=0)
           + R * jnp.sum((mean_b - mean[None, :]) ** 2, axis=0)) / cnt
    scale = gamma * lax.rsqrt(var + eps)
    shift = beta - mean * scale
    return scale, shift


def basic_block_pallas(x_ncdhw, w1, g1, b1, w2, g2, b2, eps=1e-5,
                       compute_dtype=jnp.float32):
    """BasicBlock forward.  x: (N, C, D, H, W); weights in torch OIDHW layout.

    compute_dtype: dtype of the MXU operands and of the y1/y2 HBM
    intermediates (bfloat16 recommended on hardware).  BN statistics are
    always taken from the f32 matmul accumulator.
    """
    N, Cin, D, H, W = x_ncdhw.shape
    C = w1.shape[0]
    assert Cin == C, "BasicBlock with downsample=None requires inplanes == planes"
    R = D * H * W
    cnt = float(N * R)

    offsets = _conv_offsets(H, W)
    mask27 = jnp.asarray(_conv_masks(D, H, W))                 # (27, R) f32

    # Activations as (N, C, R) == flattened NCDHW (free reshape, no transpose).
    x_cr = x_ncdhw.reshape(N, C, R)

    # im2col weight layout: column index = tap*C + cin.
    w1d = jnp.transpose(w1, (0, 2, 3, 4, 1)).reshape(C, 27 * C).astype(compute_dtype)
    w2d = jnp.transpose(w2, (0, 2, 3, 4, 1)).reshape(C, 27 * C).astype(compute_dtype)

    vmem_limit = _vmem_limit_bytes()

    def cparams(sem):
        return pltpu.CompilerParams(dimension_semantics=sem,
                                    vmem_limit_bytes=vmem_limit)

    # ---- pass A: conv1 + BN1 partial stats (lane-dense (C, R) output) ------
    y1, stats1 = pl.pallas_call(
        functools.partial(_conv1_kernel, C=C, R=R, offsets=offsets),
        grid=(N,),
        in_specs=[
            pl.BlockSpec((None, C, R), lambda n: (n, 0, 0)),
            pl.BlockSpec((27, R), lambda n: (0, 0)),
            pl.BlockSpec((C, 27 * C), lambda n: (0, 0)),
        ],
        out_specs=(
            pl.BlockSpec((None, C, R), lambda n: (n, 0, 0)),
            pl.BlockSpec((None, C, 2), lambda n: (n, 0, 0)),
        ),
        out_shape=(
            jax.ShapeDtypeStruct((N, C, R), compute_dtype),
            jax.ShapeDtypeStruct((N, C, 2), jnp.float32),
        ),
        scratch_shapes=[pltpu.VMEM((27 * C, R), compute_dtype)],
        compiler_params=cparams(("parallel",)),
    )(x_cr, mask27, w1d)

    scale1, shift1 = _combine_bn_stats(stats1, R, cnt, g1, b1, eps)

    # ---- pass B: bn1 + relu -> conv2 + BN2 partial stats --------------------
    y2, stats2 = pl.pallas_call(
        functools.partial(_bnrelu_conv2_kernel, C=C, R=R, offsets=offsets),
        grid=(N,),
        in_specs=[
            pl.BlockSpec((None, C, R), lambda n: (n, 0, 0)),
            pl.BlockSpec((C, 1), lambda n: (0, 0)),
            pl.BlockSpec((C, 1), lambda n: (0, 0)),
            pl.BlockSpec((27, R), lambda n: (0, 0)),
            pl.BlockSpec((C, 27 * C), lambda n: (0, 0)),
        ],
        out_specs=(
            pl.BlockSpec((None, C, R), lambda n: (n, 0, 0)),
            pl.BlockSpec((None, C, 2), lambda n: (n, 0, 0)),
        ),
        out_shape=(
            jax.ShapeDtypeStruct((N, C, R), compute_dtype),
            jax.ShapeDtypeStruct((N, C, 2), jnp.float32),
        ),
        scratch_shapes=[pltpu.VMEM((27 * C, R), compute_dtype)],
        compiler_params=cparams(("parallel",)),
    )(y1, scale1.reshape(C, 1), shift1.reshape(C, 1), mask27, w2d)

    scale2, shift2 = _combine_bn_stats(stats2, R, cnt, g2, b2, eps)

    # ---- pass C: bn2 + residual add + relu (lane-dense, R-tiled) ------------
    TR = _pick_r_tile(R)
    out = pl.pallas_call(
        _bn2_residual_relu_kernel,
        grid=(N, R // TR),
        in_specs=[
            pl.BlockSpec((None, C, TR), lambda n, r: (n, 0, r)),
            pl.BlockSpec((None, C, TR), lambda n, r: (n, 0, r)),
            pl.BlockSpec((C, 1), lambda n, r: (0, 0)),
            pl.BlockSpec((C, 1), lambda n, r: (0, 0)),
        ],
        out_specs=pl.BlockSpec((None, C, TR), lambda n, r: (n, 0, r)),
        out_shape=jax.ShapeDtypeStruct((N, C, R), x_ncdhw.dtype),
        compiler_params=cparams(("parallel", "parallel")),
    )(y2, x_cr, scale2.reshape(C, 1), shift2.reshape(C, 1))

    return out.reshape(N, C, D, H, W)          # (N, C, R) is NCDHW-contiguous


# --------------------------------------------------------------------------
# Pure-JAX reference (NCDHW), mirrors the PyTorch forward exactly.
# --------------------------------------------------------------------------
def basic_block_reference(x, w1, g1, b1, w2, g2, b2, eps=1e-5):
    def conv(x, w):
        return lax.conv_general_dilated(
            x, w, window_strides=(1, 1, 1), padding=[(1, 1)] * 3,
            dimension_numbers=('NCDHW', 'OIDHW', 'NCDHW'))

    def bn(y, g, b):
        mean = jnp.mean(y, axis=(0, 2, 3, 4), keepdims=True)
        var = jnp.mean((y - mean) ** 2, axis=(0, 2, 3, 4), keepdims=True)
        return ((y - mean) * lax.rsqrt(var + eps) * g.reshape(1, -1, 1, 1, 1)
                + b.reshape(1, -1, 1, 1, 1))

    out = jnp.maximum(bn(conv(x, w1), g1, b1), 0.0)
    out = bn(conv(out, w2), g2, b2)
    return jnp.maximum(out + x, 0.0)


if __name__ == "__main__":
    # Small shapes: batch=2, channels(inplanes=planes)=4, spatial=8^3 (R=512).
    N, C, D, H, W = 2, 4, 8, 8, 8

    key = jax.random.PRNGKey(0)
    kx, kw1, kw2, kg1, kb1, kg2, kb2 = jax.random.split(key, 7)

    x = jax.random.normal(kx, (N, C, D, H, W), jnp.float32)
    w1 = 0.1 * jax.random.normal(kw1, (C, C, 3, 3, 3), jnp.float32)
    w2 = 0.1 * jax.random.normal(kw2, (C, C, 3, 3, 3), jnp.float32)
    g1 = 1.0 + 0.1 * jax.random.normal(kg1, (C,), jnp.float32)
    b1 = 0.1 * jax.random.normal(kb1, (C,), jnp.float32)
    g2 = 1.0 + 0.1 * jax.random.normal(kg2, (C,), jnp.float32)
    b2 = 0.1 * jax.random.normal(kb2, (C,), jnp.float32)

    ref = jax.block_until_ready(basic_block_reference(x, w1, g1, b1, w2, g2, b2))

    # f32 MXU operands / intermediates: tight check against the f32 reference.
    out_f32 = jax.block_until_ready(
        basic_block_pallas(x, w1, g1, b1, w2, g2, b2,
                           compute_dtype=jnp.float32))
    assert out_f32.shape == (N, C, D, H, W)
    np.testing.assert_allclose(np.asarray(out_f32), np.asarray(ref),
                               rtol=1e-3, atol=1e-3)

    # bf16 MXU operands + bf16 y1/y2 intermediates (production setting):
    # looser tolerance for the bf16 rounding.
    out_bf16 = jax.block_until_ready(
        basic_block_pallas(x, w1, g1, b1, w2, g2, b2,
                           compute_dtype=jnp.bfloat16))
    np.testing.assert_allclose(np.asarray(out_bf16), np.asarray(ref),
                               rtol=6e-2, atol=6e-2)

    print("KERNEL_OK")
</pallas_src>

<mosaic_0001>
module attributes {stable_mosaic.version = 11 : i64} {
  func.func @_conv1_kernel(%arg0: i32, %arg1: memref<1x4x512xf32, #tpu.memory_space<vmem>>, %arg2: memref<27x512xf32, #tpu.memory_space<vmem>>, %arg3: memref<4x108xf32, #tpu.memory_space<vmem>>, %arg4: memref<1x4x512xf32, #tpu.memory_space<vmem>>, %arg5: memref<1x4x2xf32, #tpu.memory_space<vmem>>, %arg6: memref<108x512xf32, #tpu.memory_space<vmem>>) attributes {dimension_semantics = [#tpu.dimension_semantics<parallel>], iteration_bounds = array<i64: 2>, scalar_prefetch = 0 : i64, scratch_operands = 1 : i64, tpu.core_type = #tpu.core_type<tc>, window_params = [{transform_indices = @transform_0, window_bounds = array<i64: 1, 4, 512>}, {pipeline_mode = #tpu.pipeline_mode<synchronous>, transform_indices = @transform_1, window_bounds = array<i64: 27, 512>}, {pipeline_mode = #tpu.pipeline_mode<synchronous>, transform_indices = @transform_2, window_bounds = array<i64: 4, 108>}, {transform_indices = @transform_3, window_bounds = array<i64: 1, 4, 512>}, {transform_indices = @transform_4, window_bounds = array<i64: 1, 4, 2>}]} {
    %c0 = arith.constant 0 : index
    %c0_0 = arith.constant 0 : index
    %c0_1 = arith.constant 0 : index
    %0 = vector.load %arg1[%c0, %c0_0, %c0_1] : memref<1x4x512xf32, #tpu.memory_space<vmem>>, vector<1x4x512xf32>
    %1 = vector.shape_cast %0 : vector<1x4x512xf32> to vector<4x512xf32>
    %c73_i32 = arith.constant 73 : i32
    %2 = tpu.dynamic_rotate %1 by %c73_i32 dim 1 : vector<4x512xf32>, i32 -> vector<4x512xf32>
    %c0_2 = arith.constant 0 : index
    %c0_3 = arith.constant 0 : index
    %3 = vector.load %arg2[%c0_2, %c0_3] : memref<27x512xf32, #tpu.memory_space<vmem>>, vector<1x512xf32>
    %4 = vector.shape_cast %3 : vector<1x512xf32> to vector<512xf32>
    %5 = vector.shape_cast %4 : vector<512xf32> to vector<1x512xf32>
    %6 = vector.broadcast %5 : vector<1x512xf32> to vector<4x512xf32>
    %7 = arith.mulf %2, %6 : vector<4x512xf32>
    %c0_4 = arith.constant 0 : index
    %c0_5 = arith.constant 0 : index
    %8 = vector.load %arg6[%c0_4, %c0_5] : memref<108x512xf32, #tpu.memory_space<vmem>>, vector<4x512xf32>
    tpu.vector_store %arg6[%c0_4, %c0_5], %7 {strides = array<i32>} : memref<108x512xf32, #tpu.memory_space<vmem>>, vector<4x512xf32>,
    %c72_i32 = arith.constant 72 : i32
    %9 = tpu.dynamic_rotate %1 by %c72_i32 dim 1 : vector<4x512xf32>, i32 -> vector<4x512xf32>
    %c1 = arith.constant 1 : index
    %c0_6 = arith.constant 0 : index
    %10 = vector.load %arg2[%c1, %c0_6] : memref<27x512xf32, #tpu.memory_space<vmem>>, vector<1x512xf32>
    %11 = vector.shape_cast %10 : vector<1x512xf32> to vector<512xf32>
    %12 = vector.shape_cast %11 : vector<512xf32> to vector<1x512xf32>
    %13 = vector.broadcast %12 : vector<1x512xf32> to vector<4x512xf32>
    %14 = arith.mulf %9, %13 : vector<4x512xf32>
    %c4 = arith.constant 4 : index
    %c0_7 = arith.constant 0 : index
    %15 = vector.load %arg6[%c4, %c0_7] : memref<108x512xf32, #tpu.memory_space<vmem>>, vector<4x512xf32>
    tpu.vector_store %arg6[%c4, %c0_7], %14 {strides = array<i32>} : memref<108x512xf32, #tpu.memory_space<vmem>>, vector<4x512xf32>,
    %c71_i32 = arith.constant 71 : i32
    %16 = tpu.dynamic_rotate %1 by %c71_i32 dim 1 : vector<4x512xf32>, i32 -> vector<4x512xf32>
    %c2 = arith.constant 2 : index
    %c0_8 = arith.constant 0 : index
    %17 = vector.load %arg2[%c2, %c0_8] : memref<27x512xf32, #tpu.memory_space<vmem>>, vector<1x512xf32>
    %18 = vector.shape_cast %17 : vector<1x512xf32> to vector<512xf32>
    %19 = vector.shape_cast %18 : vector<512xf32> to vector<1x512xf32>
    %20 = vector.broadcast %19 : vector<1x512xf32> to vector<4x512xf32>
    %21 = arith.mulf %16, %20 : vector<4x512xf32>
    %c8 = arith.constant 8 : index
    %c0_9 = arith.constant 0 : index
    %22 = vector.load %arg6[%c8, %c0_9] : memref<108x512xf32, #tpu.memory_space<vmem>>, vector<4x512xf32>
    tpu.vector_store %arg6[%c8, %c0_9], %21 {strides = array<i32>} : memref<108x512xf32, #tpu.memory_space<vmem>>, vector<4x512xf32>,
    %c65_i32 = arith.constant 65 : i32
    %23 = tpu.dynamic_rotate %1 by %c65_i32 dim 1 : vector<4x512xf32>, i32 -> vector<4x512xf32>
    %c3 = arith.constant 3 : index
    %c0_10 = arith.constant 0 : index
    %24 = vector.load %arg2[%c3, %c0_10] : memref<27x512xf32, #tpu.memory_space<vmem>>, vector<1x512xf32>
    %25 = vector.shape_cast %24 : vector<1x512xf32> to vector<512xf32>
    %26 = vector.shape_cast %25 : vector<512xf32> to vector<1x512xf32>
    %27 = vector.broadcast %26 : vector<1x512xf32> to vector<4x512xf32>
    %28 = arith.mulf %23, %27 : vector<4x512xf32>
    %c12 = arith.constant 12 : index
    %c0_11 = arith.constant 0 : index
    %29 = vector.load %arg6[%c12, %c0_11] : memref<108x512xf32, #tpu.memory_space<vmem>>, vector<4x512xf32>
    tpu.vector_store %arg6[%c12, %c0_11], %28 {strides = array<i32>} : memref<108x512xf32, #tpu.memory_space<vmem>>, vector<4x512xf32>,
    %c64_i32 = arith.constant 64 : i32
    %30 = tpu.dynamic_rotate %1 by %c64_i32 dim 1 : vector<4x512xf32>, i32 -> vector<4x512xf32>
    %c4_12 = arith.constant 4 : index
    %c0_13 = arith.constant 0 : index
    %31 = vector.load %arg2[%c4_12, %c0_13] : memref<27x512xf32, #tpu.memory_space<vmem>>, vector<1x512xf32>
    %32 = vector.shape_cast %31 : vector<1x512xf32> to vector<512xf32>
    %33 = vector.shape_cast %32 : vector<512xf32> to vector<1x512xf32>
    %34 = vector.broadcast %33 : vector<1x512xf32> to vector<4x512xf32>
    %35 = arith.mulf %30, %34 : vector<4x512xf32>
    %c16 = arith.constant 16 : index
    %c0_14 = arith.constant 0 : index
    %36 = vector.load %arg6[%c16, %c0_14] : memref<108x512xf32, #tpu.memory_space<vmem>>, vector<4x512xf32>
    tpu.vector_store %arg6[%c16, %c0_14], %35 {strides = array<i32>} : memref<108x512xf32, #tpu.memory_space<vmem>>, vector<4x512xf32>,
    %c63_i32 = arith.constant 63 : i32
    %37 = tpu.dynamic_rotate %1 by %c63_i32 dim 1 : vector<4x512xf32>, i32 -> vector<4x512xf32>
    %c5 = arith.constant 5 : index
    %c0_15 = arith.constant 0 : index
    %38 = vector.load %arg2[%c5, %c0_15] : memref<27x512xf32, #tpu.memory_space<vmem>>, vector<1x512xf32>
    %39 = vector.shape_cast %38 : vector<1x512xf32> to vector<512xf32>
    %40 = vector.shape_cast %39 : vector<512xf32> to vector<1x512xf32>
    %41 = vector.broadcast %40 : vector<1x512xf32> to vector<4x512xf32>
    %42 = arith.mulf %37, %41 : vector<4x512xf32>
    %c20 = arith.constant 20 : index
    %c0_16 = arith.constant 0 : index
    %43 = vector.load %arg6[%c20, %c0_16] : memref<108x512xf32, #tpu.memory_space<vmem>>, vector<4x512xf32>
    tpu.vector_store %arg6[%c20, %c0_16], %42 {strides = array<i32>} : memref<108x512xf32, #tpu.memory_space<vmem>>, vector<4x512xf32>,
    %c57_i32 = arith.constant 57 : i32
    %44 = tpu.dynamic_rotate %1 by %c57_i32 dim 1 : vector<4x512xf32>, i32 -> vector<4x512xf32>
    %c6 = arith.constant 6 : index
    %c0_17 = arith.constant 0 : index
    %45 = vector.load %arg2[%c6, %c0_17] : memref<27x512xf32, #tpu.memory_space<vmem>>, vector<1x512xf32>
    %46 = vector.shape_cast %45 : vector<1x512xf32> to vector<512xf32>
    %47 = vector.shape_cast %46 : vector<512xf32> to vector<1x512xf32>
    %48 = vector.broadcast %47 : vector<1x512xf32> to vector<4x512xf32>
    %49 = arith.mulf %44, %48 : vector<4x512xf32>
    %c24 = arith.constant 24 : index
    %c0_18 = arith.constant 0 : index
    %50 = vector.load %arg6[%c24, %c0_18] : memref<108x512xf32, #tpu.memory_space<vmem>>, vector<4x512xf32>
    tpu.vector_store %arg6[%c24, %c0_18], %49 {strides = array<i32>} : memref<108x512xf32, #tpu.memory_space<vmem>>, vector<4x512xf32>,
    %c56_i32 = arith.constant 56 : i32
    %51 = tpu.dynamic_rotate %1 by %c56_i32 dim 1 : vector<4x512xf32>, i32 -> vector<4x512xf32>
    %c7 = arith.constant 7 : index
    %c0_19 = arith.constant 0 : index
    %52 = vector.load %arg2[%c7, %c0_19] : memref<27x512xf32, #tpu.memory_space<vmem>>, vector<1x512xf32>
    %53 = vector.shape_cast %52 : vector<1x512xf32> to vector<512xf32>
    %54 = vector.shape_cast %53 : vector<512xf32> to vector<1x512xf32>
    %55 = vector.broadcast %54 : vector<1x512xf32> to vector<4x512xf32>
    %56 = arith.mulf %51, %55 : vector<4x512xf32>
    %c28 = arith.constant 28 : index
    %c0_20 = arith.constant 0 : index
    %57 = vector.load %arg6[%c28, %c0_20] : memref<108x512xf32, #tpu.memory_space<vmem>>, vector<4x512xf32>
    tpu.vector_store %arg6[%c28, %c0_20], %56 {strides = array<i32>} : memref<108x512xf32, #tpu.memory_space<vmem>>, vector<4x512xf32>,
    %c55_i32 = arith.constant 55 : i32
    %58 = tpu.dynamic_rotate %1 by %c55_i32 dim 1 : vector<4x512xf32>, i32 -> vector<4x512xf32>
    %c8_21 = arith.constant 8 : index
    %c0_22 = arith.constant 0 : index
    %59 = vector.load %arg2[%c8_21, %c0_22] : memref<27x512xf32, #tpu.memory_space<vmem>>, vector<1x512xf32>
    %60 = vector.shape_cast %59 : vector<1x512xf32> to vector<512xf32>
    %61 = vector.shape_cast %60 : vector<512xf32> to vector<1x512xf32>
    %62 = vector.broadcast %61 : vector<1x512xf32> to vector<4x512xf32>
    %63 = arith.mulf %58, %62 : vector<4x512xf32>
    %c32 = arith.constant 32 : index
    %c0_23 = arith.constant 0 : index
    %64 = vector.load %arg6[%c32, %c0_23] : memref<108x512xf32, #tpu.memory_space<vmem>>, vector<4x512xf32>
    tpu.vector_store %arg6[%c32, %c0_23], %63 {strides = array<i32>} : memref<108x512xf32, #tpu.memory_space<vmem>>, vector<4x512xf32>,
    %c9_i32 = arith.constant 9 : i32
    %65 = tpu.dynamic_rotate %1 by %c9_i32 dim 1 : vector<4x512xf32>, i32 -> vector<4x512xf32>
    %c9 = arith.constant 9 : index
    %c0_24 = arith.constant 0 : index
    %66 = vector.load %arg2[%c9, %c0_24] : memref<27x512xf32, #tpu.memory_space<vmem>>, vector<1x512xf32>
    %67 = vector.shape_cast %66 : vector<1x512xf32> to vector<512xf32>
    %68 = vector.shape_cast %67 : vector<512xf32> to vector<1x512xf32>
    %69 = vector.broadcast %68 : vector<1x512xf32> to vector<4x512xf32>
    %70 = arith.mulf %65, %69 : vector<4x512xf32>
    %c36 = arith.constant 36 : index
    %c0_25 = arith.constant 0 : index
    %71 = vector.load %arg6[%c36, %c0_25] : memref<108x512xf32, #tpu.memory_space<vmem>>, vector<4x512xf32>
    tpu.vector_store %arg6[%c36, %c0_25], %70 {strides = array<i32>} : memref<108x512xf32, #tpu.memory_space<vmem>>, vector<4x512xf32>,
    %c8_i32 = arith.constant 8 : i32
    %72 = tpu.dynamic_rotate %1 by %c8_i32 dim 1 : vector<4x512xf32>, i32 -> vector<4x512xf32>
    %c10 = arith.constant 10 : index
    %c0_26 = arith.constant 0 : index
    %73 = vector.load %arg2[%c10, %c0_26] : memref<27x512xf32, #tpu.memory_space<vmem>>, vector<1x512xf32>
    %74 = vector.shape_cast %73 : vector<1x512xf32> to vector<512xf32>
    %75 = vector.shape_cast %74 : vector<512xf32> to vector<1x512xf32>
    %76 = vector.broadcast %75 : vector<1x512xf32> to vector<4x512xf32>
    %77 = arith.mulf %72, %76 : vector<4x512xf32>
    %c40 = arith.constant 40 : index
    %c0_27 = arith.constant 0 : index
    %78 = vector.load %arg6[%c40, %c0_27] : memref<108x512xf32, #tpu.memory_space<vmem>>, vector<4x512xf32>
    tpu.vector_store %arg6[%c40, %c0_27], %77 {strides = array<i32>} : memref<108x512xf32, #tpu.memory_space<vmem>>, vector<4x512xf32>,
    %c7_i32 = arith.constant 7 : i32
    %79 = tpu.dynamic_rotate %1 by %c7_i32 dim 1 : vector<4x512xf32>, i32 -> vector<4x512xf32>
    %c11 = arith.constant 11 : index
    %c0_28 = arith.constant 0 : index
    %80 = vector.load %arg2[%c11, %c0_28] : memref<27x512xf32, #tpu.memory_space<vmem>>, vector<1x512xf32>
    %81 = vector.shape_cast %80 : vector<1x512xf32> to vector<512xf32>
    %82 = vector.shape_cast %81 : vector<512xf32> to vector<1x512xf32>
    %83 = vector.broadcast %82 : vector<1x512xf32> to vector<4x512xf32>
    %84 = arith.mulf %79, %83 : vector<4x512xf32>
    %c44 = arith.constant 44 : index
    %c0_29 = arith.constant 0 : index
    %85 = vector.load %arg6[%c44, %c0_29] : memref<108x512xf32, #tpu.memory_space<vmem>>, vector<4x512xf32>
    tpu.vector_store %arg6[%c44, %c0_29], %84 {strides = array<i32>} : memref<108x512xf32, #tpu.memory_space<vmem>>, vector<4x512xf32>,
    %c1_i32 = arith.constant 1 : i32
    %86 = tpu.dynamic_rotate %1 by %c1_i32 dim 1 : vector<4x512xf32>, i32 -> vector<4x512xf32>
    %c12_30 = arith.constant 12 : index
    %c0_31 = arith.constant 0 : index
    %87 = vector.load %arg2[%c12_30, %c0_31] : memref<27x512xf32, #tpu.memory_space<vmem>>, vector<1x512xf32>
    %88 = vector.shape_cast %87 : vector<1x512xf32> to vector<512xf32>
    %89 = vector.shape_cast %88 : vector<512xf32> to vector<1x512xf32>
    %90 = vector.broadcast %89 : vector<1x512xf32> to vector<4x512xf32>
    %91 = arith.mulf %86, %90 : vector<4x512xf32>
    %c48 = arith.constant 48 : index
    %c0_32 = arith.constant 0 : index
    %92 = vector.load %arg6[%c48, %c0_32] : memref<108x512xf32, #tpu.memory_space<vmem>>, vector<4x512xf32>
    tpu.vector_store %arg6[%c48, %c0_32], %91 {strides = array<i32>} : memref<108x512xf32, #tpu.memory_space<vmem>>, vector<4x512xf32>,
    %c13 = arith.constant 13 : index
    %c0_33 = arith.constant 0 : index
    %93 = vector.load %arg2[%c13, %c0_33] : memref<27x512xf32, #tpu.memory_space<vmem>>, vector<1x512xf32>
    %94 = vector.shape_cast %93 : vector<1x512xf32> to vector<512xf32>
    %95 = vector.shape_cast %94 : vector<512xf32> to vector<1x512xf32>
    %96 = vector.broadcast %95 : vector<1x512xf32> to vector<4x512xf32>
    %97 = arith.mulf %1, %96 : vector<4x512xf32>
    %c52 = arith.constant 52 : index
    %c0_34 = arith.constant 0 : index
    %98 = vector.load %arg6[%c52, %c0_34] : memref<108x512xf32, #tpu.memory_space<vmem>>, vector<4x512xf32>
    tpu.vector_store %arg6[%c52, %c0_34], %97 {strides = array<i32>} : memref<108x512xf32, #tpu.memory_space<vmem>>, vector<4x512xf32>,
    %c511_i32 = arith.constant 511 : i32
    %99 = tpu.dynamic_rotate %1 by %c511_i32 dim 1 : vector<4x512xf32>, i32 -> vector<4x512xf32>
    %c14 = arith.constant 14 : index
    %c0_35 = arith.constant 0 : index
    %100 = vector.load %arg2[%c14, %c0_35] : memref<27x512xf32, #tpu.memory_space<vmem>>, vector<1x512xf32>
    %101 = vector.shape_cast %100 : vector<1x512xf32> to vector<512xf32>
    %102 = vector.shape_cast %101 : vector<512xf32> to vector<1x512xf32>
    %103 = vector.broadcast %102 : vector<1x512xf32> to vector<4x512xf32>
    %104 = arith.mulf %99, %103 : vector<4x512xf32>
    %c56 = arith.constant 56 : index
    %c0_36 = arith.constant 0 : index
    %105 = vector.load %arg6[%c56, %c0_36] : memref<108x512xf32, #tpu.memory_space<vmem>>, vector<4x512xf32>
    tpu.vector_store %arg6[%c56, %c0_36], %104 {strides = array<i32>} : memref<108x512xf32, #tpu.memory_space<vmem>>, vector<4x512xf32>,
    %c505_i32 = arith.constant 505 : i32
    %106 = tpu.dynamic_rotate %1 by %c505_i32 dim 1 : vector<4x512xf32>, i32 -> vector<4x512xf32>
    %c15 = arith.constant 15 : index
    %c0_37 = arith.constant 0 : index
    %107 = vector.load %arg2[%c15, %c0_37] : memref<27x512xf32, #tpu.memory_space<vmem>>, vector<1x512xf32>
    %108 = vector.shape_cast %107 : vector<1x512xf32> to vector<512xf32>
    %109 = vector.shape_cast %108 : vector<512xf32> to vector<1x512xf32>
    %110 = vector.broadcast %109 : vector<1x512xf32> to vector<4x512xf32>
    %111 = arith.mulf %106, %110 : vector<4x512xf32>
    %c60 = arith.constant 60 : index
    %c0_38 = arith.constant 0 : index
    %112 = vector.load %arg6[%c60, %c0_38] : memref<108x512xf32, #tpu.memory_space<vmem>>, vector<4x512xf32>
    tpu.vector_store %arg6[%c60, %c0_38], %111 {strides = array<i32>} : memref<108x512xf32, #tpu.memory_space<vmem>>, vector<4x512xf32>,
    %c504_i32 = arith.constant 504 : i32
    %113 = tpu.dynamic_rotate %1 by %c504_i32 dim 1 : vector<4x512xf32>, i32 -> vector<4x512xf32>
    %c16_39 = arith.constant 16 : index
    %c0_40 = arith.constant 0 : index
    %114 = vector.load %arg2[%c16_39, %c0_40] : memref<27x512xf32, #tpu.memory_space<vmem>>, vector<1x512xf32>
    %115 = vector.shape_cast %114 : vector<1x512xf32> to vector<512xf32>
    %116 = vector.shape_cast %115 : vector<512xf32> to vector<1x512xf32>
    %117 = vector.broadcast %116 : vector<1x512xf32> to vector<4x512xf32>
    %118 = arith.mulf %113, %117 : vector<4x512xf32>
    %c64 = arith.constant 64 : index
    %c0_41 = arith.constant 0 : index
    %119 = vector.load %arg6[%c64, %c0_41] : memref<108x512xf32, #tpu.memory_space<vmem>>, vector<4x512xf32>
    tpu.vector_store %arg6[%c64, %c0_41], %118 {strides = array<i32>} : memref<108x512xf32, #tpu.memory_space<vmem>>, vector<4x512xf32>,
    %c503_i32 = arith.constant 503 : i32
    %120 = tpu.dynamic_rotate %1 by %c503_i32 dim 1 : vector<4x512xf32>, i32 -> vector<4x512xf32>
    %c17 = arith.constant 17 : index
    %c0_42 = arith.constant 0 : index
    %121 = vector.load %arg2[%c17, %c0_42] : memref<27x512xf32, #tpu.memory_space<vmem>>, vector<1x512xf32>
    %122 = vector.shape_cast %121 : vector<1x512xf32> to vector<512xf32>
    %123 = vector.shape_cast %122 : vector<512xf32> to vector<1x512xf32>
    %124 = vector.broadcast %123 : vector<1x512xf32> to vector<4x512xf32>
    %125 = arith.mulf %120, %124 : vector<4x512xf32>
    %c68 = arith.constant 68 : index
    %c0_43 = arith.constant 0 : index
    %126 = vector.load %arg6[%c68, %c0_43] : memref<108x512xf32, #tpu.memory_space<vmem>>, vector<4x512xf32>
    tpu.vector_store %arg6[%c68, %c0_43], %125 {strides = array<i32>} : memref<108x512xf32, #tpu.memory_space<vmem>>, vector<4x512xf32>,
    %c457_i32 = arith.constant 457 : i32
    %127 = tpu.dynamic_rotate %1 by %c457_i32 dim 1 : vector<4x512xf32>, i32 -> vector<4x512xf32>
    %c18 = arith.constant 18 : index
    %c0_44 = arith.constant 0 : index
    %128 = vector.load %arg2[%c18, %c0_44] : memref<27x512xf32, #tpu.memory_space<vmem>>, vector<1x512xf32>
    %129 = vector.shape_cast %128 : vector<1x512xf32> to vector<512xf32>
    %130 = vector.shape_cast %129 : vector<512xf32> to vector<1x512xf32>
    %131 = vector.broadcast %130 : vector<1x512xf32> to vector<4x512xf32>
    %132 = arith.mulf %127, %131 : vector<4x512xf32>
    %c72 = arith.constant 72 : index
    %c0_45 = arith.constant 0 : index
    %133 = vector.load %arg6[%c72, %c0_45] : memref<108x512xf32, #tpu.memory_space<vmem>>, vector<4x512xf32>
    tpu.vector_store %arg6[%c72, %c0_45], %132 {strides = array<i32>} : memref<108x512xf32, #tpu.memory_space<vmem>>, vector<4x512xf32>,
    %c456_i32 = arith.constant 456 : i32
    %134 = tpu.dynamic_rotate %1 by %c456_i32 dim 1 : vector<4x512xf32>, i32 -> vector<4x512xf32>
    %c19 = arith.constant 19 : index
    %c0_46 = arith.constant 0 : index
    %135 = vector.load %arg2[%c19, %c0_46] : memref<27x512xf32, #tpu.memory_space<vmem>>, vector<1x512xf32>
    %136 = vector.shape_cast %135 : vector<1x512xf32> to vector<512xf32>
    %137 = vector.shape_cast %136 : vector<512xf32> to vector<1x512xf32>
    %138 = vector.broadcast %137 : vector<1x512xf32> to vector<4x512xf32>
    %139 = arith.mulf %134, %138 : vector<4x512xf32>
    %c76 = arith.constant 76 : index
    %c0_47 = arith.constant 0 : index
    %140 = vector.load %arg6[%c76, %c0_47] : memref<108x512xf32, #tpu.memory_space<vmem>>, vector<4x512xf32>
    tpu.vector_store %arg6[%c76, %c0_47], %139 {strides = array<i32>} : memref<108x512xf32, #tpu.memory_space<vmem>>, vector<4x512xf32>,
    %c455_i32 = arith.constant 455 : i32
    %141 = tpu.dynamic_rotate %1 by %c455_i32 dim 1 : vector<4x512xf32>, i32 -> vector<4x512xf32>
    %c20_48 = arith.constant 20 : index
    %c0_49 = arith.constant 0 : index
    %142 = vector.load %arg2[%c20_48, %c0_49] : memref<27x512xf32, #tpu.memory_space<vmem>>, vector<1x512xf32>
    %143 = vector.shape_cast %142 : vector<1x512xf32> to vector<512xf32>
    %144 = vector.shape_cast %143 : vector<512xf32> to vector<1x512xf32>
    %145 = vector.broadcast %144 : vector<1x512xf32> to vector<4x512xf32>
    %146 = arith.mulf %141, %145 : vector<4x512xf32>
    %c80 = arith.constant 80 : index
    %c0_50 = arith.constant 0 : index
    %147 = vector.load %arg6[%c80, %c0_50] : memref<108x512xf32, #tpu.memory_space<vmem>>, vector<4x512xf32>
    tpu.vector_store %arg6[%c80, %c0_50], %146 {strides = array<i32>} : memref<108x512xf32, #tpu.memory_space<vmem>>, vector<4x512xf32>,
    %c449_i32 = arith.constant 449 : i32
    %148 = tpu.dynamic_rotate %1 by %c449_i32 dim 1 : vector<4x512xf32>, i32 -> vector<4x512xf32>
    %c21 = arith.constant 21 : index
    %c0_51 = arith.constant 0 : index
    %149 = vector.load %arg2[%c21, %c0_51] : memref<27x512xf32, #tpu.memory_space<vmem>>, vector<1x512xf32>
    %150 = vector.shape_cast %149 : vector<1x512xf32> to vector<512xf32>
    %151 = vector.shape_cast %150 : vector<512xf32> to vector<1x512xf32>
    %152 = vector.broadcast %151 : vector<1x512xf32> to vector<4x512xf32>
    %153 = arith.mulf %148, %152 : vector<4x512xf32>
    %c84 = arith.constant 84 : index
    %c0_52 = arith.constant 0 : index
    %154 = vector.load %arg6[%c84, %c0_52] : memref<108x512xf32, #tpu.memory_space<vmem>>, vector<4x512xf32>
    tpu.vector_store %arg6[%c84, %c0_52], %153 {strides = array<i32>} : memref<108x512xf32, #tpu.memory_space<vmem>>, vector<4x512xf32>,
    %c448_i32 = arith.constant 448 : i32
    %155 = tpu.dynamic_rotate %1 by %c448_i32 dim 1 : vector<4x512xf32>, i32 -> vector<4x512xf32>
    %c22 = arith.constant 22 : index
    %c0_53 = arith.constant 0 : index
    %156 = vector.load %arg2[%c22, %c0_53] : memref<27x512xf32, #tpu.memory_space<vmem>>, vector<1x512xf32>
    %157 = vector.shape_cast %156 : vector<1x512xf32> to vector<512xf32>
    %158 = vector.shape_cast %157 : vector<512xf32> to vector<1x512xf32>
    %159 = vector.broadcast %158 : vector<1x512xf32> to vector<4x512xf32>
    %160 = arith.mulf %155, %159 : vector<4x512xf32>
    %c88 = arith.constant 88 : index
    %c0_54 = arith.constant 0 : index
    %161 = vector.load %arg6[%c88, %c0_54] : memref<108x512xf32, #tpu.memory_space<vmem>>, vector<4x512xf32>
    tpu.vector_store %arg6[%c88, %c0_54], %160 {strides = array<i32>} : memref<108x512xf32, #tpu.memory_space<vmem>>, vector<4x512xf32>,
    %c447_i32 = arith.constant 447 : i32
    %162 = tpu.dynamic_rotate %1 by %c447_i32 dim 1 : vector<4x512xf32>, i32 -> vector<4x512xf32>
    %c23 = arith.constant 23 : index
    %c0_55 = arith.constant 0 : index
    %163 = vector.load %arg2[%c23, %c0_55] : memref<27x512xf32, #tpu.memory_space<vmem>>, vector<1x512xf32>
    %164 = vector.shape_cast %163 : vector<1x512xf32> to vector<512xf32>
    %165 = vector.shape_cast %164 : vector<512xf32> to vector<1x512xf32>
    %166 = vector.broadcast %165 : vector<1x512xf32> to vector<4x512xf32>
    %167 = arith.mulf %162, %166 : vector<4x512xf32>
    %c92 = arith.constant 92 : index
    %c0_56 = arith.constant 0 : index
    %168 = vector.load %arg6[%c92, %c0_56] : memref<108x512xf32, #tpu.memory_space<vmem>>, vector<4x512xf32>
    tpu.vector_store %arg6[%c92, %c0_56], %167 {strides = array<i32>} : memref<108x512xf32, #tpu.memory_space<vmem>>, vector<4x512xf32>,
    %c441_i32 = arith.constant 441 : i32
    %169 = tpu.dynamic_rotate %1 by %c441_i32 dim 1 : vector<4x512xf32>, i32 -> vector<4x512xf32>
    %c24_57 = arith.constant 24 : index
    %c0_58 = arith.constant 0 : index
    %170 = vector.load %arg2[%c24_57, %c0_58] : memref<27x512xf32, #tpu.memory_space<vmem>>, vector<1x512xf32>
    %171 = vector.shape_cast %170 : vector<1x512xf32> to vector<512xf32>
    %172 = vector.shape_cast %171 : vector<512xf32> to vector<1x512xf32>
    %173 = vector.broadcast %172 : vector<1x512xf32> to vector<4x512xf32>
    %174 = arith.mulf %169, %173 : vector<4x512xf32>
    %c96 = arith.constant 96 : index
    %c0_59 = arith.constant 0 : index
    %175 = vector.load %arg6[%c96, %c0_59] : memref<108x512xf32, #tpu.memory_space<vmem>>, vector<4x512xf32>
    tpu.vector_store %arg6[%c96, %c0_59], %174 {strides = array<i32>} : memref<108x512xf32, #tpu.memory_space<vmem>>, vector<4x512xf32>,
    %c440_i32 = arith.constant 440 : i32
    %176 = tpu.dynamic_rotate %1 by %c440_i32 dim 1 : vector<4x512xf32>, i32 -> vector<4x512xf32>
    %c25 = arith.constant 25 : index
    %c0_60 = arith.constant 0 : index
    %177 = vector.load %arg2[%c25, %c0_60] : memref<27x512xf32, #tpu.memory_space<vmem>>, vector<1x512xf32>
    %178 = vector.shape_cast %177 : vector<1x512xf32> to vector<512xf32>
    %179 = vector.shape_cast %178 : vector<512xf32> to vector<1x512xf32>
    %180 = vector.broadcast %179 : vector<1x512xf32> to vector<4x512xf32>
    %181 = arith.mulf %176, %180 : vector<4x512xf32>
    %c100 = arith.constant 100 : index
    %c0_61 = arith.constant 0 : index
    %182 = vector.load %arg6[%c100, %c0_61] : memref<108x512xf32, #tpu.memory_space<vmem>>, vector<4x512xf32>
    tpu.vector_store %arg6[%c100, %c0_61], %181 {strides = array<i32>} : memref<108x512xf32, #tpu.memory_space<vmem>>, vector<4x512xf32>,
    %c439_i32 = arith.constant 439 : i32
    %183 = tpu.dynamic_rotate %1 by %c439_i32 dim 1 : vector<4x512xf32>, i32 -> vector<4x512xf32>
    %c26 = arith.constant 26 : index
    %c0_62 = arith.constant 0 : index
    %184 = vector.load %arg2[%c26, %c0_62] : memref<27x512xf32, #tpu.memory_space<vmem>>, vector<1x512xf32>
    %185 = vector.shape_cast %184 : vector<1x512xf32> to vector<512xf32>
    %186 = vector.shape_cast %185 : vector<512xf32> to vector<1x512xf32>
    %187 = vector.broadcast %186 : vector<1x512xf32> to vector<4x512xf32>
    %188 = arith.mulf %183, %187 : vector<4x512xf32>
    %c104 = arith.constant 104 : index
    %c0_63 = arith.constant 0 : index
    %189 = vector.load %arg6[%c104, %c0_63] : memref<108x512xf32, #tpu.memory_space<vmem>>, vector<4x512xf32>
    tpu.vector_store %arg6[%c104, %c0_63], %188 {strides = array<i32>} : memref<108x512xf32, #tpu.memory_space<vmem>>, vector<4x512xf32>,
    %c0_64 = arith.constant 0 : index
    %c0_65 = arith.constant 0 : index
    %190 = vector.load %arg3[%c0_64, %c0_65] : memref<4x108xf32, #tpu.memory_space<vmem>>, vector<4x108xf32>
    %c0_66 = arith.constant 0 : index
    %c0_67 = arith.constant 0 : index
    %191 = vector.load %arg6[%c0_66, %c0_67] : memref<108x512xf32, #tpu.memory_space<vmem>>, vector<108x512xf32>
    %cst = arith.constant dense<0.000000e+00> : vector<4x512xf32>
    %192 = tpu.matmul %190, %191, %cst {dimension_numbers = #tpu.dot_dimension_numbers<[1], [0], [0], [1], [0, 0, 1, 1], [], []>} : vector<4x108xf32>, vector<108x512xf32>, vector<4x512xf32> -> vector<4x512xf32>
    %c0_68 = arith.constant 0 : index
    %c0_69 = arith.constant 0 : index
    %c0_70 = arith.constant 0 : index
    %193 = vector.load %arg4[%c0_68, %c0_69, %c0_70] : memref<1x4x512xf32, #tpu.memory_space<vmem>>, vector<1x4x512xf32>
    %194 = vector.shape_cast %193 : vector<1x4x512xf32> to vector<4x512xf32>
    %195 = vector.shape_cast %192 : vector<4x512xf32> to vector<1x4x512xf32>
    tpu.vector_store %arg4[%c0_68, %c0_69, %c0_70], %195 {strides = array<i32>} : memref<1x4x512xf32, #tpu.memory_space<vmem>>, vector<1x4x512xf32>,
    %cst_71 = arith.constant dense<0.000000e+00> : vector<4xf32>
    %196 = vector.multi_reduction <add>, %192, %cst_71 [1] : vector<4x512xf32> to vector<4xf32>
    %197 = vector.shape_cast %196 : vector<4xf32> to vector<4x1xf32>
    %cst_72 = arith.constant 0.001953125 : f32
    %198 = vector.broadcast %cst_72 : f32 to vector<4x1xf32>
    %199 = arith.mulf %197, %198 : vector<4x1xf32>
    %200 = vector.broadcast %199 : vector<4x1xf32> to vector<4x512xf32>
    %201 = arith.subf %192, %200 : vector<4x512xf32>
    %202 = arith.mulf %201, %201 : vector<4x512xf32>
    %cst_73 = arith.constant dense<0.000000e+00> : vector<4xf32>
    %203 = vector.multi_reduction <add>, %202, %cst_73 [1] : vector<4x512xf32> to vector<4xf32>
    %204 = vector.shape_cast %203 : vector<4xf32> to vector<4x1xf32>
    %205 = tpu.concatenate %197, %204 in 1 : vector<4x1xf32>, vector<4x1xf32> -> vector<4x2xf32>
    %c0_74 = arith.constant 0 : index
    %c0_75 = arith.constant 0 : index
    %c0_76 = arith.constant 0 : index
    %206 = vector.load %arg5[%c0_74, %c0_75, %c0_76] : memref<1x4x2xf32, #tpu.memory_space<vmem>>, vector<1x4x2xf32>
    %207 = vector.shape_cast %206 : vector<1x4x2xf32> to vector<4x2xf32>
    %208 = vector.shape_cast %205 : vector<4x2xf32> to vector<1x4x2xf32>
    tpu.vector_store %arg5[%c0_74, %c0_75, %c0_76], %208 {strides = array<i32>} : memref<1x4x2xf32, #tpu.memory_space<vmem>>, vector<1x4x2xf32>,
    return
  }
  func.func @transform_0(%arg0: i32) -> (i32, i32, i32) {
    %c0_i32 = arith.constant 0 : i32
    %c0_i32_0 = arith.constant 0 : i32
    %c0_i32_1 = arith.constant 0 : i32
    return %arg0, %c0_i32, %c0_i32_0 : i32, i32, i32
  }
  func.func @transform_1(%arg0: i32) -> (i32, i32) {
    %c0_i32 = arith.constant 0 : i32
    %c0_i32_0 = arith.constant 0 : i32
    %c0_i32_1 = arith.constant 0 : i32
    return %c0_i32, %c0_i32_0 : i32, i32
  }
  func.func @transform_2(%arg0: i32) -> (i32, i32) {
    %c0_i32 = arith.constant 0 : i32
    %c0_i32_0 = arith.constant 0 : i32
    %c0_i32_1 = arith.constant 0 : i32
    return %c0_i32, %c0_i32_0 : i32, i32
  }
  func.func @transform_3(%arg0: i32) -> (i32, i32, i32) {
    %c0_i32 = arith.constant 0 : i32
    %c0_i32_0 = arith.constant 0 : i32
    %c0_i32_1 = arith.constant 0 : i32
    return %arg0, %c0_i32, %c0_i32_0 : i32, i32, i32
  }
  func.func @transform_4(%arg0: i32) -> (i32, i32, i32) {
    %c0_i32 = arith.constant 0 : i32
    %c0_i32_0 = arith.constant 0 : i32
    %c0_i32_1 = arith.constant 0 : i32
    return %arg0, %c0_i32, %c0_i32_0 : i32, i32, i32
  }
}

</mosaic_0001>

<bundles_post_ra>
// kernel: tpu_custom_call.1
= control target key start
LH: loop header
LB: loop body
LE: loop exit
PB: predicated region body
PF: predicated region fallthrough
CT: control target
= control target key end

     0   :  { %10 = vsyncpa [#allocation4], 0  ;;  %s3036_s0 = inlined_call_operand.hbm [shape: f32[2,4,512], index: 0, kind: input, shape index: {}]   ;;  %s3037_s1 = inlined_call_operand.hbm [shape: f32[27,512], index: 1, kind: input, shape index: {}]   ;;  %s3038_s2 = inlined_call_operand.hbm [shape: f32[4,108], index: 2, kind: input, shape index: {}]   ;;  %s3039_s3 = inlined_call_operand.hbm [shape: f32[2,4,512], index: 3, kind: output, shape index: {0}]   ;;  %s3040_s4 = inlined_call_operand.vmem [shape: f32[2,4,2], index: 4, kind: output, shape index: {1}]  }
   0x1   :  { %12 = vsyncpa [#allocation4 + $0x1], 0 }
   0x2   :  { %13 = vsyncpa [#allocation7], 0 }
   0x3   :  { %14 = vsyncpa [#allocation5], 0 }
   0x4   :  { %16 = vsyncpa [#allocation5 + $0x1], 0  ;;  %s2174_s15 = smov 0   ;;  %s2176_s16 = smov 0  }
   0x5   :  { %s2178_s17 = smov 0   ;;  %s2180_s18 = smov 0  }
   0x6 LB: > { %s2195_s19 = sadd.s32 4294967295, %s2123_s18   ;;  %s1859_s20 = sadd.s32 4294967294, %s2123_s18   ;;  %s2123_s18 = sphi %s2180_s18, %s3062_s18   ;;  %s2119_s17 = sphi %s2178_s17, %s3061_s17   ;;  %s2115_s16 = sphi %s2176_s16, %s3060_s16   ;;  %s2111_s15 = sphi %s2174_s15, %s3059_s15  }
   0x7   : > { %p42_p0 = scmp.ne.s32.totalorder %s2115_s16, %s2111_s15  ;;  %p3041_p1 = scmp.eq.s32.totalorder %s2195_s19, 0 }
   0x8   : > { %p114_p3 = scmp.eq.s32.totalorder %s1859_s20, 1  ;;  %p1860_p5 = scmp.ge.s32.totalorder %s2123_s18, 1 }
   0x9   : > { %p2204_p4 = por %p3041_p1, %p42_p0  ;;  %p147_p7 = scmp.lt.s32.totalorder %s2123_s18, 3 }
   0xa   : > { %p2209_p6 = por %p114_p3, %p42_p0  ;;  %s2125_s24 = smov [#allocation6]  }
   0xb   : > { %s3045_s21 = scalar_select %p2204_p4, 1, 0 }
   0xc   : > { %s3046_s22 = scalar_select %p2209_p6, 1, 0 }
   0xd   : > { %p2214_p8 = pnand %p1860_p5, %p147_p7  ;;  %s159_s25 = sshll.u32 %s2125_s24, 4  ;;  %s160_s25 = int_to_ptr.vmem [resolvable:$true] %s159_s25 }
   0xe   : > { %s2126_s27 = smov [#allocation8]   ;;  %s1986_s29 = scalar_lea.vmem %s160_s25, 2048 }
   0xf   : > { %s3047_s23 = scalar_select %p2214_p8, 1, 0 }
  0x10   : > { %p1898_p9 = pneg %p2214_p8  ;;  %s173_s28 = sshll.u32 %s2126_s27, 4  ;;  %s174_s28 = int_to_ptr.vmem [resolvable:$true] %s173_s28 }
  0x11   : > { %p1987_p13 = scmp.ne.s32.totalorder %s160_s25, %s1986_s29  ;;  %p1994_p5 = scmp.lt.s32.totalorder %s160_s25, %s160_s25 }
  0x12   : > { %p2223_p11 = pnand %p1898_p9, %p3041_p1  ;;  %p1995_p7 = scmp.lt.s32.totalorder %s1986_s29, %s1986_s29 }
  0x14   : > { %p1977_p12 = pneg %p2223_p11  ;;  %p1996_p10 = por %p1995_p7, %p1994_p5 }
  0x16   : > { %p1989_p0 = pnand %p1987_p13, %p1977_p12 }
  0x18   : > { %p1990_p3 = pneg %p1989_p0 }
  0x1a   : > { %p1997_p9 = pnand %p1996_p10, %p1990_p3 }
  0x1c   : > { %2000 = shalt.err (!%p1997_p9)
}
  0x1d   : > { %s2127_s30 = smov 512   ;;  %s2128_s5 = smov 32  }
  0x1e   : > { %1901 = dma.hbm_to_vmem [thread:$0]  (!%p2223_p11), %s3037_s1, 2048, %s160_s25, [#allocation7], %s2127_s30, %s2127_s30, %s2128_s5  }
  0x1f   : > { %s2012_s8 = scalar_lea.vmem %s174_s28, 64  ;;  %p2020_p2 = scmp.lt.s32.totalorder %s174_s28, %s174_s28 }
  0x20   : > { %p2013_p1 = scmp.ne.s32.totalorder %s174_s28, %s2012_s8  ;;  %p2021_p6 = scmp.lt.s32.totalorder %s2012_s8, %s2012_s8 }
  0x22   : > { %p2015_p13 = pnand %p2013_p1, %p1977_p12  ;;  %p2022_p5 = por %p2021_p6, %p2020_p2 }
  0x24   : > { %p2016_p0 = pneg %p2015_p13 }
  0x26   : > { %p2023_p10 = pnand %p2022_p5, %p2016_p0 }
  0x28   : > { %2026 = shalt.err (!%p2023_p10)
}
  0x29   : > { %1904 = dma.hbm_to_vmem [thread:$0]  (!%p2223_p11), %s3038_s2, 64, %s174_s28, [#allocation7]  }
  0x2a   : > { %s2246_s11 = sadd.s32 1, %s2123_s18   ;;  %s29_s12 = sadd.s32 1, %s2119_s17 }
  0x2b   : > { %s26_s13 = ssub.s32 %s2123_s18, %s2246_s11  ;;  %p36_p1 = scmp.ne.s32.totalorder %s2119_s17, %s2115_s16 }
  0x2c   : > { %p27_p2 = scmp.eq.s32.totalorder %s26_s13, 0  ;;  %p37_p6 = scmp.eq.s32.totalorder %s2123_s18, 0 }
  0x2d   : > { %p3049_p12 = scmp.eq.s32.totalorder %s2195_s19, 1  ;;  %p1915_p7 = scmp.lt.s32.totalorder %s2123_s18, 2 }
  0x2e   : > { %s2262_s20 = scalar_select %p27_p2, %s2119_s17, %s29_s12  }
  0x2f   : > { %p2256_p3 = por %p3049_p12, %p36_p1  ;;  %p38_p9 = por %p37_p6, %p36_p1 }
  0x30   : > { %s184_s24 = sand.u32 1, %s2119_s17   ;;  %s1884_s26 = sshll.u32 %s2123_s18, 8 }
  0x31   : > { %s3050_s14 = scalar_select %p2256_p3, 1, 0 }
  0x32   : > { %s1864_s25 = sshll.u32 %s184_s24, 4  ;;  %s2269_s29 = scalar_lea.hbm %s3036_s0, %s1884_s26 }
  0x33   : > { %s188_s30 = scalar_lea.vmem [#allocation3], %s1864_s25  ;;  %p2271_p11 = pnand %p1915_p7, %p38_p9 }
  0x34   : > { %s196_s5 = sshll.u32 %s188_s30, 4  ;;  %s185_s7 = scalar_lea.sflag [#allocation4], %s184_s24  ;;  %s197_s5 = int_to_ptr.vmem [resolvable:$true] %s196_s5 }
  0x35   : > { %s2027_s8 = scalar_lea.hbm %s2269_s29, 256  ;;  %p2029_p0 = pneg %p2271_p11 }
  0x36   : > { %p2028_p13 = scmp.ne.s32.totalorder %s2269_s29, %s2027_s8  ;;  %s2032_s12 = scalar_lea.hbm %s3036_s0, 512 }
  0x37   : > { %p2033_p1 = scmp.lt.s32.totalorder %s2269_s29, %s3036_s0  ;;  %p2034_p2 = scmp.lt.s32.totalorder %s2032_s12, %s2027_s8 }
  0x38   : > { %p2030_p5 = pnand %p2029_p0, %p2028_p13 }
  0x39   : > { %p2035_p6 = por %p2034_p2, %p2033_p1 }
  0x3a   : > { %p2031_p10 = pneg %p2030_p5 }
  0x3c   : > { %p2036_p12 = pnand %p2035_p6, %p2031_p10 }
  0x3e   : > { %2039 = shalt.err (!%p2036_p12)
}
  0x3f   : > { %s2040_s26 = scalar_lea.vmem %s197_s5, 256  ;;  %s2129_s24 = smov [#allocation3]  }
  0x40   : > { %p2041_p7 = scmp.ne.s32.totalorder %s197_s5, %s2040_s26  ;;  %s2045_s27 = sshll.u32 %s2129_s24, 4  ;;  %s2046_s27 = int_to_ptr.vmem [resolvable:$false] %s2045_s27 }
  0x41   : > { %s2047_s28 = scalar_lea.vmem %s2046_s27, 512  ;;  %p2048_p13 = scmp.lt.s32.totalorder %s197_s5, %s2046_s27 }
  0x42   : > { %p2043_p9 = pnand %p2041_p7, %p2029_p0  ;;  %p2049_p5 = scmp.lt.s32.totalorder %s2047_s28, %s2040_s26 }
  0x44   : > { %p2044_p3 = pneg %p2043_p9  ;;  %p2050_p4 = por %p2049_p5, %p2048_p13 }
  0x46   : > { %p2051_p8 = pnand %p2050_p4, %p2044_p3 }
  0x48   : > { %2054 = shalt.err (!%p2051_p8)
}
  0x49   : > { %1908 = dma.hbm_to_vmem [thread:$0]  (!%p2271_p11), %s2269_s29, 256, %s197_s5, %s185_s7  }
  0x4a   : > { %p3052_p10 = scmp.ne.s32.totalorder %s3047_s23, 0 }
  0x4b   : > { %s2292_s30 = sand.u32 (!%p3052_p10), 1, %s2115_s16   ;;  %p3053_p4 = scmp.ne.s32.totalorder (!%p3052_p10), %s3045_s21, 0 }
  0x4c   : > { %205 = sbr.rel (%p3052_p10) target bundleno = 846 (0x34e), region = 32  ;;  %s1868_s8 = sshll.u32 (!%p3052_p10), %s2292_s30, 4 }
  0x4d   : > { %s208_s9 = scalar_lea.sflag (!%p3052_p10), [#allocation4], %s2292_s30  ;;  %s211_s10 = scalar_lea.vmem (!%p3052_p10), [#allocation3], %s1868_s8 }
  0x51   : > { %2098 = dma.done.wait (%p3053_p4), %s208_s9, 256  }
  0x52   : > { %2100 = vsyncadd (%p3053_p4), %s208_s9, 4294967040  ;;  %p3054_p8 = scmp.eq.s32.totalorder %s2195_s19, 0 }
  0x54   : > { %2102 = dma.done.wait (%p3054_p8), [#allocation7], 2112   ;;  %p3055_p3 = pmov %p3054_p8 }
  0x55   : > { %v2306_v0 = vld [vmem:[%s211_s10 + $0x8] sm:$0xff]  ;;  %s2130_s23 = smov 55   ;;  %s2131_s29 = smov 56   ;;  %v2310_v1 = vld [vmem:[%s211_s10] sm:$0xff]  ;;  %v268_v4 = vlaneseq  ;;  %vm1528_vm4 = vcmask 1043456  }
  0x56   : > { %2104 = vsyncadd (%p3055_p3), [#allocation7], 4294965184  ;;  %665 = vrot.lane.b32.xlu1 %v2306_v0, %s2130_s23  ;;  %609 = vrot.lane.b32.xlu0 %v2306_v0, %s2131_s29  ;;  %v2316_v2 = vcombine.high %v2310_v1, %v2310_v1  ;;  %s2132_s21 = smov 63   ;;  %s2133_s5 = smov 57   ;;  %v2332_v3 = vcombine.high %v2306_v0, %v2306_v0 }
  0x57   : > { %s2134_s6 = smov 65   ;;  %s2135_s7 = smov 64   ;;  %v278_v5 = vshrl.u32 %v268_v4, 7  ;;  %v906_v8 = vld [vmem:[#allocation6 + $0x25] ss:$8 sm:$0xf] }
  0x58   : > { %s2136_s12 = smov 72   ;;  %s2137_s13 = smov 71   ;;  %v2407_v18 = vand.u32 127, %v268_v4  ;;  %v2417_v22 = vld [vmem:[#allocation6 + $0x20] ss:$8 sm:$0xf] }
  0x59   : > { %s2138_s25 = smov 73   ;;  %s2139_s26 = smov 119   ;;  %v2368_v6 = vsub.s32 0, %v278_v5  ;;  %v2370_v7 = vsub.s32 1, %v278_v5  ;;  %v2397_v14 = vsub.s32 2, %v278_v5  ;;  %v2399_v15 = vsub.s32 3, %v278_v5 }
  0x5a   : > { %661 = vrot.lane.b32.xlu1 %v2310_v1, %s2130_s23  ;;  %605 = vrot.lane.b32.xlu0 %v2310_v1, %s2131_s29  ;;  %s2140_s24 = smov 121   ;;  %s2141_s27 = smov 120   ;;  %vm669_vm0 = vcmp.lt.s32.totalorder %v2407_v18, 55  ;;  %v2421_v24 = vld [vmem:[#allocation6 + $0x62] ss:$8 sm:$0xf] }
  0x5b   : > { %s2142_s28 = smov 127   ;;  %v911_v9 = vrot.slane %v906_v8, %v2368_v6  ;;  %v915_v10 = vrot.slane %v906_v8, %v2370_v7  ;;  %s2143_s9 = smov 7   ;;  %v919_v16 = vrot.slane %v906_v8, %v2397_v14  ;;  %v923_v17 = vrot.slane %v906_v8, %v2399_v15  ;;  %v2427_v27 = vld [vmem:[#allocation6 + $0x7] ss:$8 sm:$0xf] }
  0x5c   : > { %s2144_s10 = smov 1   ;;  %v2429_v28 = vld [vmem:[#allocation6 + $0x61] ss:$8 sm:$0xf]  ;;  %v684_v30 = vrot.slane %v2417_v22, %v2370_v7  ;;  %v688_v33 = vrot.slane %v2417_v22, %v2397_v14  ;;  %v1442_v34 = vrot.slane %v2421_v24, %v2368_v6  ;;  %v1446_v35 = vrot.slane %v2421_v24, %v2370_v7  ;;  %p3056_p0 = scmp.ne.s32.totalorder %s3050_s14, 0 }
  0x5d   : > { %v924_v11 = vcombine.low %v911_v9, %v915_v10  ;;  %v925_v19 = vcombine.low %v919_v16, %v923_v17  ;;  %v2433_v31 = vld [vmem:[#allocation6 + $0x5] ss:$8 sm:$0xf]  ;;  %v2435_v32 = vld [vmem:[#allocation6 + $0x47] ss:$8 sm:$0xf]  ;;  %v628_v36 = vrot.slane %v2427_v27, %v2370_v7  ;;  %v632_v37 = vrot.slane %v2427_v27, %v2397_v14 }
  0x5e   : > { %663 = vrot.lane.b32.xlu1 %v2316_v2, %s2130_s23  ;;  %607 = vrot.lane.b32.xlu0 %v2316_v2, %s2131_s29  ;;  %vm613_vm1 = vcmp.lt.s32.totalorder %v2407_v18, 56  ;;  %v1399_v38 = vrot.slane %v2429_v28, %v2368_v6  ;;  %v1403_v39 = vrot.slane %v2429_v28, %v2370_v7  ;;  %vm513_vm2 = vcmp.lt.s32.totalorder %v2407_v18, 63  ;;  %v2477_v56 = vld [vmem:[#allocation6 + $0x6] ss:$8 sm:$0xf] }
  0x5f   : > { %v928_v12 = vmul.f32 %v924_v11, %v2310_v1  ;;  %v929_v23 = vmul.f32 %v925_v19, %v2306_v0  ;;  %v532_v42 = vrot.slane %v2433_v31, %v2397_v14  ;;  %v1329_v43 = vrot.slane %v2435_v32, %v2370_v7  ;;  %v2479_v57 = vld [vmem:[#allocation6 + $0x60] ss:$8 sm:$0xf]  ;;  %v2504_v17 = vld [vmem:[#allocation6 + $0x3] ss:$8 sm:$0xf] }
  0x60   : > { %vm569_vm3 = vcmp.lt.s32.totalorder %v2407_v18, 57  ;;  %v584_v10 = vrot.slane %v2477_v56, %v2370_v7  ;;  %v1368_v16 = vrot.slane %v2479_v57, %v2368_v6  ;;  %vm413_vm5 = vcmp.lt.s32.totalorder %v2407_v18, 65 }
  0x61   : > { %937 = vst [vmem:[#allocation2 + $0xf8] sm:$0xf0] %v928_v12  ;;  %v932_v13 = vcombine.low %v928_v12, %v928_v12  ;;  %939 = vst [vmem:[#allocation2 + $0xb8] sm:$0xf0] %v929_v23  ;;  %v933_v29 = vcombine.low %v929_v23, %v929_v23  ;;  %vm469_vm6 = vcmp.lt.s32.totalorder %v2407_v18, 64  ;;  %vm313_vm7 = vcmp.lt.s32.totalorder %v2407_v18, 72 }
  0x62   : > { %509 = vrot.lane.b32.xlu1 %v2306_v0, %s2132_s21  ;;  %507 = vrot.lane.b32.xlu0 %v2316_v2, %s2132_s21  ;;  %vm369_vm8 = vcmp.lt.s32.totalorder %v2407_v18, 71  ;;  %vm270_vm9 = vcmp.lt.s32.totalorder %v2407_v18, 73  ;;  %vm1092_vm10 = vcmp.lt.s32.totalorder %v2407_v18, 119  ;;  %vm992_vm11 = vcmp.lt.s32.totalorder %v2407_v18, 121 }
  0x63   : > { %936 = vst [vmem:[#allocation2 + $0xe8] sm:$0xf0] %v932_v13  ;;  %938 = vst [vmem:[#allocation2 + $0x190] sm:$0xf0] %v933_v29  ;;  %v528_v29 = vrot.slane %v2433_v31, %v2370_v7  ;;  %vm1048_vm12 = vcmp.lt.s32.totalorder %v2407_v18, 120  ;;  %vm948_vm13 = vcmp.lt.s32.totalorder %v2407_v18, 127 }
  0x64   : > { %vm813_vm14 = vcmp.lt.s32.totalorder %v2407_v18, 7  ;;  %vm869_vm15 = vcmp.lt.s32.totalorder %v2407_v18, 1 }
  0x66   : > { %565 = vrot.lane.b32.xlu1 %v2306_v0, %s2133_s5  ;;  %563 = vrot.lane.b32.xlu0 %v2316_v2, %s2133_s5 }
  0x6a   : > { %561 = vrot.lane.b32.xlu1 %v2310_v1, %s2133_s5  ;;  %505 = vrot.lane.b32.xlu0 %v2310_v1, %s2132_s21 }
  0x6e   : > { %409 = vrot.lane.b32.xlu1 %v2306_v0, %s2134_s6  ;;  %407 = vrot.lane.b32.xlu0 %v2316_v2, %s2134_s6 }
  0x72   : > { %465 = vrot.lane.b32.xlu1 %v2306_v0, %s2135_s7  ;;  %463 = vrot.lane.b32.xlu0 %v2316_v2, %s2135_s7 }
  0x76   : > { %667 = vrot.lane.b32.xlu1 %v2332_v3, %s2130_s23  ;;  %611 = vrot.lane.b32.xlu0 %v2332_v3, %s2131_s29  ;;  %s2145_s23 = smov 9   ;;  %s2146_s29 = smov 8  }
  0x7a   : > { %461 = vrot.lane.b32.xlu1 %v2310_v1, %s2135_s7  ;;  %405 = vrot.lane.b32.xlu0 %v2310_v1, %s2134_s6 }
  0x7e   : > { %309 = vrot.lane.b32.xlu1 %v2306_v0, %s2136_s12  ;;  %307 = vrot.lane.b32.xlu0 %v2316_v2, %s2136_s12 }
  0x82   : > { %365 = vrot.lane.b32.xlu1 %v2306_v0, %s2137_s13  ;;  %363 = vrot.lane.b32.xlu0 %v2316_v2, %s2137_s13 }
  0x86   : > { %567 = vrot.lane.b32.xlu1 %v2332_v3, %s2133_s5  ;;  %511 = vrot.lane.b32.xlu0 %v2332_v3, %s2132_s21  ;;  %s2983_s21 = scalar_lea.vmem [#allocation9], %s1868_s8  ;;  %s1885_s8 = sshll.u32 %s2195_s19, 8 }
  0x87   : > { %s1743_s5 = sshll.u32 %s2983_s21, 4  ;;  %s1744_s5 = int_to_ptr.vmem [resolvable:$true] %s1743_s5 }
  0x8a   : > { %361 = vrot.lane.b32.xlu1 %v2310_v1, %s2137_s13  ;;  %305 = vrot.lane.b32.xlu0 %v2310_v1, %s2136_s12 }
  0x8e   : > { %264 = vrot.lane.b32.xlu1 %v2306_v0, %s2138_s25  ;;  %262 = vrot.lane.b32.xlu0 %v2316_v2, %s2138_s25 }
  0x92   : > { %467 = vrot.lane.b32.xlu1 %v2332_v3, %s2135_s7  ;;  %411 = vrot.lane.b32.xlu0 %v2332_v3, %s2134_s6 }
  0x96   : > { %1088 = vrot.lane.b32.xlu1 %v2306_v0, %s2139_s26  ;;  %1086 = vrot.lane.b32.xlu0 %v2316_v2, %s2139_s26 }
  0x9a   : > { %1084 = vrot.lane.b32.xlu1 %v2310_v1, %s2139_s26  ;;  %260 = vrot.lane.b32.xlu0 %v2310_v1, %s2138_s25 }
  0x9e   : > { %367 = vrot.lane.b32.xlu1 %v2332_v3, %s2137_s13  ;;  %311 = vrot.lane.b32.xlu0 %v2332_v3, %s2136_s12  ;;  %s1741_s12 = scalar_lea.hbm %s3039_s3, %s1885_s8  ;;  %s1725_s13 = scalar_lea.sflag [#allocation5], %s2292_s30 }
  0xa2   : > { %988 = vrot.lane.b32.xlu1 %v2306_v0, %s2140_s24  ;;  %986 = vrot.lane.b32.xlu0 %v2316_v2, %s2140_s24 }
  0xa6   : > { %1044 = vrot.lane.b32.xlu1 %v2306_v0, %s2141_s27  ;;  %1042 = vrot.lane.b32.xlu0 %v2316_v2, %s2141_s27 }
  0xaa   : > { %1040 = vrot.lane.b32.xlu1 %v2310_v1, %s2141_s27  ;;  %984 = vrot.lane.b32.xlu0 %v2310_v1, %s2140_s24 }
  0xae   : > { %942 = vrot.lane.b32.xlu1 %v2316_v2, %s2142_s28  ;;  %266 = vrot.lane.b32.xlu0 %v2332_v3, %s2138_s25  ;;  %s2055_s25 = scalar_lea.vmem %s1744_s5, 256 }
  0xaf   : > { %p2056_p11 = scmp.ne.s32.totalorder %s1744_s5, %s2055_s25 }
  0xb1   : > { %p2057_p1 = pnand %p2056_p11, %p3056_p0 }
  0xb2   : > { %1090 = vrot.lane.b32.xlu1 %v2332_v3, %s2139_s26  ;;  %944 = vrot.lane.b32.xlu0 %v2306_v0, %s2142_s28  ;;  %s2148_s26 = smov [#allocation9]  }
  0xb3   : > { %p2058_p2 = pneg %p2057_p1 }
  0xb6   : > { %805 = vrot.lane.b32.xlu1 %v2310_v1, %s2143_s9  ;;  %940 = vrot.lane.b32.xlu0 %v2310_v1, %s2142_s28 }
  0xba   : > { %861 = vrot.lane.b32.xlu1 %v2310_v1, %s2144_s10  ;;  %807 = vrot.lane.b32.xlu0 %v2316_v2, %s2143_s9 }
  0xbe   : > { %990 = vrot.lane.b32.xlu1 %v2332_v3, %s2140_s24  ;;  %863 = vrot.lane.b32.xlu0 %v2316_v2, %s2144_s10  ;;  %s2059_s24 = sshll.u32 %s2148_s26, 4  ;;  %s2060_s24 = int_to_ptr.vmem [resolvable:$false] %s2059_s24 }
  0xbf   : > { %p2062_p6 = scmp.lt.s32.totalorder %s1744_s5, %s2060_s24 }
  0xc2   : > { %811 = vrot.lane.b32.xlu1 %v2332_v3, %s2143_s9  ;;  %1046 = vrot.lane.b32.xlu0 %v2332_v3, %s2141_s27  ;;  %s2061_s27 = scalar_lea.vmem %s2060_s24, 512 }
  0xc3   : > { %p2063_p12 = scmp.lt.s32.totalorder %s2061_s27, %s2055_s25 }
  0xc5   : > { %p2064_p7 = por %p2063_p12, %p2062_p6 }
  0xc6   : > { %705 = vrot.lane.b32.xlu1 %v2310_v1, %s2145_s23  ;;  %867 = vrot.lane.b32.xlu0 %v2332_v3, %s2144_s10 }
  0xc7   : > { %p2065_p9 = pnand %p2064_p7, %p2058_p2 }
  0xc8   : > { %v2409_v20 = vpop.permute.xlu1 %665  ;;  %v2411_v21 = vpop.permute.xlu0 %609 }
  0xca   : > { %761 = vrot.lane.b32.xlu1 %v2310_v1, %s2146_s29  ;;  %707 = vrot.lane.b32.xlu0 %v2316_v2, %s2145_s23 }
  0xcc   : > { %v2423_v25 = vpop.permute.xlu1 %661  ;;  %v2425_v26 = vpop.permute.xlu0 %605 }
  0xce   : > { %946 = vrot.lane.b32.xlu1 %v2332_v3, %s2142_s28  ;;  %763 = vrot.lane.b32.xlu0 %v2316_v2, %s2146_s29  ;;  %v588_v2 = vrot.slane %v2477_v56, %v2397_v14 }
  0xd0   : > { %v664_v40 = vpop.permute.xlu1 %663  ;;  %v608_v41 = vpop.permute.xlu0 %607 }
  0xd1   : > { %v671_v44 = vsel %vm669_vm0, %v664_v40, %v2409_v20  ;;  %v672_v45 = vsel %vm669_vm0, %v2423_v25, %v664_v40  ;;  %v615_v46 = vsel %vm613_vm1, %v608_v41, %v2411_v21  ;;  %v616_v47 = vsel %vm613_vm1, %v2425_v26, %v608_v41 }
  0xd2   : > { %v698_v48 = vmul.f32 %v684_v30, %v672_v45  ;;  %v699_v49 = vmul.f32 %v688_v33, %v671_v44  ;;  %v1459_v50 = vmul.f32 %v1442_v34, %v672_v45  ;;  %v1460_v51 = vmul.f32 %v1446_v35, %v671_v44  ;;  %767 = vrot.lane.b32.xlu1 %v2332_v3, %s2146_s29  ;;  %v2512_v33 = vld [vmem:[#allocation6 + $0x45] ss:$8 sm:$0xf] }
  0xd3   : > { %v642_v52 = vmul.f32 %v628_v36, %v616_v47  ;;  %v643_v53 = vmul.f32 %v632_v37, %v615_v46  ;;  %v1416_v54 = vmul.f32 %v1399_v38, %v616_v47  ;;  %v1417_v55 = vmul.f32 %v1403_v39, %v615_v46  ;;  %711 = vrot.lane.b32.xlu0 %v2332_v3, %s2145_s23  ;;  %v2533_v46 = vld [vmem:[#allocation6 + $0x4] ss:$8 sm:$0xf]  ;;  %v2535_v47 = vld [vmem:[#allocation6 + $0x46] ss:$8 sm:$0xf] }
  0xd4   : > { %702 = vst [vmem:[#allocation2 + $0x188] sm:$0xf] %v698_v48  ;;  %703 = vst [vmem:[#allocation2 + $0x138] sm:$0xf] %v699_v49  ;;  %v2481_v58 = vpop.permute.xlu1 %509  ;;  %v508_v59 = vpop.permute.xlu0 %507  ;;  %v1372_v3 = vrot.slane %v2479_v57, %v2370_v7  ;;  %v1325_v30 = vrot.slane %v2435_v32, %v2368_v6  ;;  %v432_v38 = vrot.slane %v2504_v17, %v2397_v14  ;;  %v2147_v45 = vmov 0.0  }
  0xd5   : > { %1463 = vst [vmem:[#allocation2 + $0x58] sm:$0xf] %v1459_v50  ;;  %1464 = vst [vmem:[#allocation2 + $0xf0] sm:$0xf] %v1460_v51  ;;  %v650_v60 = vrot.slane %v642_v52, 4  ;;  %v651_v61 = vrot.slane %v643_v53, 4  ;;  %v515_v1 = vsel %vm513_vm2, %v508_v59, %v2481_v58  ;;  %v1255_v40 = vrot.slane %v2512_v33, %v2370_v7  ;;  %1605 = vmatprep.mubr.f32.mxu0 %v2147_v45 }
  0xd6   : > { %v1424_v62 = vrot.slane %v1416_v54, 4  ;;  %v1425_v63 = vrot.slane %v1417_v55, 4  ;;  %865 = vrot.lane.b32.xlu1 %v2306_v0, %s2144_s10  ;;  %v543_v4 = vmul.f32 %v532_v42, %v515_v1  ;;  %v1343_v5 = vmul.f32 %v1329_v43, %v515_v1  ;;  %1676 = vmatprep.mubr.f32.mxu1 %v2147_v45 }
  0xd7   : > { %658 = vst [vmem:[#allocation2 + $0x150] sm:$0xf0] %v650_v60  ;;  %659 = vst [vmem:[#allocation2 + $0x108] sm:$0xf0] %v651_v61  ;;  %809 = vrot.lane.b32.xlu0 %v2306_v0, %s2143_s9  ;;  %v488_v55 = vrot.slane %v2533_v46, %v2397_v14 }
  0xd8   : > { %1432 = vst [vmem:[#allocation2 + $0x128] sm:$0xf0] %v1424_v62  ;;  %1433 = vst [vmem:[#allocation2 + $0x38] sm:$0xf0] %v1425_v63  ;;  %v2495_v8 = vpop.permute.xlu1 %565  ;;  %v564_v9 = vpop.permute.xlu0 %563  ;;  %v551_v11 = vrot.slane %v543_v4, 4  ;;  %v1351_v12 = vrot.slane %v1343_v5, 4  ;;  %v1450_v4 = vrot.slane %v2421_v24, %v2397_v14 }
  0xd9   : > { %v571_v13 = vsel %vm569_vm3, %v564_v9, %v2495_v8 }
  0xda   : > { %v599_v19 = vmul.f32 %v588_v2, %v571_v13  ;;  %v1386_v23 = vmul.f32 %v1372_v3, %v571_v13  ;;  %765 = vrot.lane.b32.xlu1 %v2306_v0, %s2146_s29  ;;  %559 = vst [vmem:[#allocation2 + $0x118] sm:$0xf0] %v551_v11  ;;  %1359 = vst [vmem:[#allocation2 + $0x78] sm:$0xf0] %v1351_v12  ;;  %v680_v3 = vrot.slane %v2417_v22, %v2368_v6 }
  0xdb   : > { %709 = vrot.lane.b32.xlu0 %v2306_v0, %s2145_s23  ;;  %v1454_v11 = vrot.slane %v2421_v24, %v2399_v15  ;;  %v624_v13 = vrot.slane %v2427_v27, %v2368_v6  ;;  %v484_v24 = vrot.slane %v2533_v46, %v2370_v7 }
  0xdc   : > { %v1521_v34 = vld [vmem:[#allocation2 + $0xf0] sm:$0xf]  ;;  %v1520_v35 = vld [vmem:[#allocation2 + $0x58] sm:$0xf]  ;;  %603 = vst [vmem:[#allocation2 + $0x108] sm:$0xf] %v599_v19  ;;  %v2517_v36 = vpop.permute.xlu1 %561  ;;  %v2519_v37 = vpop.permute.xlu0 %505  ;;  %v1407_v19 = vrot.slane %v2429_v28, %v2397_v14 }
  0xdd   : > { %1390 = vst [vmem:[#allocation2 + $0x38] sm:$0xf] %v1386_v23  ;;  %1873 = vmatprep.subr.msk.mxu0 %vm1528_vm4, %v1521_v34  ;;  %v572_v39 = vsel %vm569_vm3, %v2517_v36, %v564_v9  ;;  %v516_v0 = vsel %vm513_vm2, %v2519_v37, %v508_v59  ;;  %v1298_v59 = vrot.slane %v2535_v47, %v2370_v7 }
  0xde   : > { %1874 = vmatpush1.msk.msra.mxu0 %vm1528_vm4, %v1520_v35  ;;  %v598_v41 = vmul.f32 %v584_v10, %v572_v39  ;;  %v1385_v42 = vmul.f32 %v1368_v16, %v572_v39  ;;  %v542_v43 = vmul.f32 %v528_v29, %v516_v0  ;;  %v1342_v44 = vmul.f32 %v1325_v30, %v516_v0 }
  0xdf   : > { %v692_v10 = vrot.slane %v2417_v22, %v2399_v15  ;;  %v636_v16 = vrot.slane %v2427_v27, %v2399_v15  ;;  %v1411_v23 = vrot.slane %v2429_v28, %v2399_v15  ;;  %v1294_v30 = vrot.slane %v2535_v47, %v2368_v6 }
  0xe0   : > { %602 = vst [vmem:[#allocation2 + $0x150] sm:$0xf] %v598_v41  ;;  %1389 = vst [vmem:[#allocation2 + $0x128] sm:$0xf] %v1385_v42  ;;  %v550_v48 = vrot.slane %v542_v43, 4  ;;  %v1350_v49 = vrot.slane %v1342_v44, 4  ;;  %v2537_v50 = vpop.permute.xlu1 %409  ;;  %v2539_v51 = vpop.permute.xlu0 %407  ;;  %v428_v27 = vrot.slane %v2504_v17, %v2370_v7  ;;  %v1251_v34 = vrot.slane %v2512_v33, %v2368_v6 }
  0xe1   : > { %v415_v52 = vsel %vm413_vm5, %v2539_v51, %v2537_v50 }
  0xe2   : > { %558 = vst [vmem:[#allocation2 + $0x110] sm:$0xf0] %v550_v48  ;;  %1358 = vst [vmem:[#allocation2 + $0x70] sm:$0xf0] %v1350_v49  ;;  %v443_v53 = vmul.f32 %v432_v38, %v415_v52  ;;  %v1269_v54 = vmul.f32 %v1255_v40, %v415_v52 }
  0xe3   : > { %v2591_v48 = vld [vmem:[#allocation6 + $0x1] ss:$8 sm:$0xf]  ;;  %v2593_v49 = vld [vmem:[#allocation6 + $0x43] ss:$8 sm:$0xf] }
  0xe4   : > { %v1517_v60 = vld [vmem:[#allocation2 + $0x38] sm:$0xff]  ;;  %v451_v61 = vrot.slane %v443_v53, 4  ;;  %v1277_v62 = vrot.slane %v1269_v54, 4  ;;  %v2550_v63 = vpop.permute.xlu1 %465  ;;  %v464_v1 = vpop.permute.xlu0 %463 }
  0xe5   : > { %1547 = vmatprep.subr.mxu0 %v1517_v60  ;;  %v471_v2 = vsel %vm469_vm6, %v464_v1, %v2550_v63  ;;  %v332_v60 = vrot.slane %v2591_v48, %v2397_v14 }
  0xe6   : > { %459 = vst [vmem:[#allocation2 + $0x130] sm:$0xf0] %v451_v61  ;;  %1285 = vst [vmem:[#allocation2 + $0x100] sm:$0xf0] %v1277_v62  ;;  %v499_v5 = vmul.f32 %v488_v55, %v471_v2  ;;  %v1312_v9 = vmul.f32 %v1298_v59, %v471_v2  ;;  %v1181_v61 = vrot.slane %v2593_v49, %v2370_v7 }
  0xe7   : > { %v1516_v12 = vld [vmem:[#allocation2 + $0x128] sm:$0xff] }
  0xe8   : > { %503 = vst [vmem:[#allocation2 + $0x118] sm:$0xf] %v499_v5  ;;  %1316 = vst [vmem:[#allocation2 + $0x78] sm:$0xf] %v1312_v9  ;;  %v668_v29 = vpop.permute.xlu1 %667  ;;  %1548 = vmatpush1.msra.mxu0 %v1516_v12  ;;  %v612_v22 = vpop.permute.xlu0 %611 }
  0xe9   : > { %v670_v28 = vsel %vm669_vm0, %v2409_v20, %v668_v29  ;;  %v673_v35 = vsel %vm669_vm0, %v668_v29, %v2423_v25  ;;  %v614_v38 = vsel %vm613_vm1, %v2411_v21, %v612_v22  ;;  %v617_v39 = vsel %vm613_vm1, %v612_v22, %v2425_v26  ;;  %v2611_v62 = vld [vmem:[#allocation6 + $0x2] ss:$8 sm:$0xf]  ;;  %v2613_v9 = vld [vmem:[#allocation6 + $0x44] ss:$8 sm:$0xf] }
  0xea   : > { %v697_v0 = vmul.f32 %v680_v3, %v673_v35  ;;  %v700_v40 = vmul.f32 %v692_v10, %v670_v28  ;;  %v1461_v41 = vmul.f32 %v1450_v4, %v670_v28  ;;  %v1462_v42 = vmul.f32 %v1454_v11, %v673_v35 }
  0xeb   : > { %v641_v43 = vmul.f32 %v624_v13, %v617_v39  ;;  %v644_v44 = vmul.f32 %v636_v16, %v614_v38  ;;  %v1418_v45 = vmul.f32 %v1407_v19, %v614_v38  ;;  %v1419_v20 = vmul.f32 %v1411_v23, %v617_v39 }
  0xec   : > { %701 = vst [vmem:[#allocation2 + $0xe0] sm:$0xf] %v697_v0  ;;  %704 = vst [vmem:[#allocation2 + $0x140] sm:$0xf] %v700_v40  ;;  %v2595_v21 = vpop.permute.xlu1 %461  ;;  %v2597_v25 = vpop.permute.xlu0 %405  ;;  %v388_v23 = vrot.slane %v2611_v62, %v2397_v14  ;;  %v1224_v29 = vrot.slane %v2613_v9, %v2370_v7  ;;  %v580_v38 = vrot.slane %v2477_v56, %v2368_v6  ;;  %vm713_vm0 = vcmp.lt.s32.totalorder %v2407_v18, 9 }
  0xed   : > { %1465 = vst [vmem:[#allocation2 + $0x30] sm:$0xf] %v1461_v41  ;;  %1466 = vst [vmem:[#allocation2 + $0x198] sm:$0xf] %v1462_v42  ;;  %v649_v26 = vrot.slane %v641_v43, 4  ;;  %v652_v52 = vrot.slane %v644_v44, 4  ;;  %v472_v55 = vsel %vm469_vm6, %v2595_v21, %v464_v1  ;;  %v416_v59 = vsel %vm413_vm5, %v2597_v25, %v2539_v51 }
  0xee   : > { %v1426_v53 = vrot.slane %v1418_v45, 4  ;;  %v1427_v54 = vrot.slane %v1419_v20, 4  ;;  %v498_v2 = vmul.f32 %v484_v24, %v472_v55  ;;  %v1311_v3 = vmul.f32 %v1294_v30, %v472_v55 }
  0xef   : > { %657 = vst [vmem:[#allocation2 + $0x120] sm:$0xf0] %v649_v26  ;;  %660 = vst [vmem:[#allocation2 + $0x60] sm:$0xf0] %v652_v52  ;;  %v442_v1 = vmul.f32 %v428_v27, %v416_v59  ;;  %v1268_v4 = vmul.f32 %v1251_v34, %v416_v59  ;;  %v1513_v5 = vld [vmem:[#allocation2 + $0x78] sm:$0xff]  ;;  %v592_v39 = vrot.slane %v2477_v56, %v2399_v15  ;;  %vm769_vm1 = vcmp.lt.s32.totalorder %v2407_v18, 8 }
  0xf0   : > { %1434 = vst [vmem:[#allocation2 + $0x88] sm:$0xf0] %v1426_v53  ;;  %1435 = vst [vmem:[#allocation2 + $0x170] sm:$0xf0] %v1427_v54  ;;  %v2615_v51 = vpop.permute.xlu1 %309  ;;  %1549 = vmatprep.subr.mxu0 %v1513_v5  ;;  %v2617_v10 = vpop.permute.xlu0 %307  ;;  %v1376_v41 = vrot.slane %v2479_v57, %v2397_v14  ;;  %v1380_v42 = vrot.slane %v2479_v57, %v2399_v15  ;;  %v524_v43 = vrot.slane %v2433_v31, %v2368_v6 }
  0xf1   : > { %502 = vst [vmem:[#allocation2 + $0x110] sm:$0xf] %v498_v2  ;;  %1315 = vst [vmem:[#allocation2 + $0x70] sm:$0xf] %v1311_v3  ;;  %v450_v11 = vrot.slane %v442_v1, 4  ;;  %v1276_v12 = vrot.slane %v1268_v4, 4  ;;  %v315_v13 = vsel %vm313_vm7, %v2617_v10, %v2615_v51  ;;  %v536_v44 = vrot.slane %v2433_v31, %v2399_v15 }
  0xf2   : > { %v343_v16 = vmul.f32 %v332_v60, %v315_v13  ;;  %v1195_v19 = vmul.f32 %v1181_v61, %v315_v13  ;;  %v1333_v45 = vrot.slane %v2435_v32, %v2397_v14  ;;  %v1337_v56 = vrot.slane %v2435_v32, %v2399_v15 }
  0xf3   : > { %458 = vst [vmem:[#allocation2 + $0x168] sm:$0xf0] %v450_v11  ;;  %1284 = vst [vmem:[#allocation2 + $0x10] sm:$0xf0] %v1276_v12  ;;  %v384_v57 = vrot.slane %v2611_v62, %v2370_v7  ;;  %v1220_v53 = vrot.slane %v2613_v9, %v2368_v6  ;;  %v328_v31 = vrot.slane %v2591_v48, %v2370_v7 }
  0xf4   : > { %v1523_v22 = vld [vmem:[#allocation2 + $0x198] sm:$0xf]  ;;  %v1522_v24 = vld [vmem:[#allocation2 + $0x30] sm:$0xf]  ;;  %v351_v30 = vrot.slane %v343_v16, 4  ;;  %v1203_v27 = vrot.slane %v1195_v19, 4  ;;  %v2629_v34 = vpop.permute.xlu1 %365  ;;  %v364_v28 = vpop.permute.xlu0 %363  ;;  %v1177_v54 = vrot.slane %v2593_v49, %v2368_v6 }
  0xf5   : > { %1876 = vmatprep.subr.msk.mxu1 %vm1528_vm4, %v1523_v22  ;;  %v371_v35 = vsel %vm369_vm8, %v364_v28, %v2629_v34  ;;  %v2671_v12 = vld [vmem:[#allocation6] ss:$8 sm:$0xf] }
  0xf6   : > { %1877 = vmatpush1.msk.msra.mxu1 %vm1528_vm4, %v1522_v24  ;;  %359 = vst [vmem:[#allocation2 + $0xd8] sm:$0xf0] %v351_v30  ;;  %1211 = vst [vmem:[#allocation2 + $0xa8] sm:$0xf0] %v1203_v27  ;;  %v399_v0 = vmul.f32 %v388_v23, %v371_v35  ;;  %v1238_v40 = vmul.f32 %v1224_v29, %v371_v35  ;;  %v288_v24 = vrot.slane %v2671_v12, %v2397_v14 }
  0xf8   : > { %403 = vst [vmem:[#allocation2 + $0x130] sm:$0xf] %v399_v0  ;;  %1242 = vst [vmem:[#allocation2 + $0x100] sm:$0xf] %v1238_v40  ;;  %v568_v20 = vpop.permute.xlu1 %567  ;;  %v1512_v26 = vld [vmem:[#allocation2 + $0x70] sm:$0xff]  ;;  %v512_v52 = vpop.permute.xlu0 %511 }
  0xf9   : > { %v570_v32 = vsel %vm569_vm3, %v2495_v8, %v568_v20  ;;  %v573_v55 = vsel %vm569_vm3, %v568_v20, %v2517_v36  ;;  %1550 = vmatpush1.msra.mxu0 %v1512_v26  ;;  %v514_v59 = vsel %vm513_vm2, %v2481_v58, %v512_v52  ;;  %v517_v60 = vsel %vm513_vm2, %v512_v52, %v2519_v37  ;;  %v2673_v36 = vld [vmem:[#allocation6 + $0x42] ss:$8 sm:$0xf] }
  0xfa   : > { %v597_v61 = vmul.f32 %v580_v38, %v573_v55  ;;  %v600_v2 = vmul.f32 %v592_v39, %v570_v32  ;;  %v1387_v3 = vmul.f32 %v1376_v41, %v570_v32  ;;  %v1388_v1 = vmul.f32 %v1380_v42, %v573_v55 }
  0xfb   : > { %v541_v4 = vmul.f32 %v524_v43, %v517_v60  ;;  %v544_v5 = vmul.f32 %v536_v44, %v514_v59  ;;  %v1344_v8 = vmul.f32 %v1333_v45, %v514_v59  ;;  %v1345_v11 = vmul.f32 %v1337_v56, %v517_v60  ;;  %v2703_v45 = vld [vmem:[#allocation6 + $0x41] ss:$8 sm:$0xf] }
  0xfc   : > { %601 = vst [vmem:[#allocation2 + $0x120] sm:$0xf] %v597_v61  ;;  %604 = vst [vmem:[#allocation2 + $0x60] sm:$0xf] %v600_v2  ;;  %v2675_v58 = vpop.permute.xlu1 %361  ;;  %v2677_v13 = vpop.permute.xlu0 %305  ;;  %v1150_v30 = vrot.slane %v2673_v36, %v2370_v7  ;;  %v492_v44 = vrot.slane %v2533_v46, %v2399_v15  ;;  %v1302_v26 = vrot.slane %v2535_v47, %v2397_v14  ;;  %vm1524_vm2 = vcmask 883712  }
  0xfd   : > { %1391 = vst [vmem:[#allocation2 + $0x88] sm:$0xf] %v1387_v3  ;;  %1392 = vst [vmem:[#allocation2 + $0x170] sm:$0xf] %v1388_v1  ;;  %v549_v37 = vrot.slane %v541_v4, 4  ;;  %v552_v16 = vrot.slane %v544_v5, 4  ;;  %v372_v29 = vsel %vm369_vm8, %v2675_v58, %v364_v28  ;;  %v316_v22 = vsel %vm313_vm7, %v2677_v13, %v2617_v10 }
  0xfe   : > { %v1352_v19 = vrot.slane %v1344_v8, 4  ;;  %v1353_v23 = vrot.slane %v1345_v11, 4  ;;  %v398_v27 = vmul.f32 %v384_v57, %v372_v29  ;;  %v1237_v35 = vmul.f32 %v1220_v53, %v372_v29 }
  0xff   : > { %557 = vst [vmem:[#allocation2 + $0x180] sm:$0xf0] %v549_v37  ;;  %560 = vst [vmem:[#allocation2 + $0x98] sm:$0xf0] %v552_v16  ;;  %v342_v38 = vmul.f32 %v328_v31, %v316_v22  ;;  %v1194_v39 = vmul.f32 %v1177_v54, %v316_v22  ;;  %v1509_v28 = vld [vmem:[#allocation2 + $0x100] sm:$0xff]  ;;  %v480_v10 = vrot.slane %v2533_v46, %v2368_v6 }
 0x100   : > { %1360 = vst [vmem:[#allocation2 + $0xa0] sm:$0xf0] %v1352_v19  ;;  %1361 = vst [vmem:[#allocation2 + $0x158] sm:$0xf0] %v1353_v23  ;;  %v2691_v0 = vpop.permute.xlu1 %264  ;;  %1551 = vmatprep.subr.mxu0 %v1509_v28  ;;  %v2693_v40 = vpop.permute.xlu0 %262  ;;  %v1306_v52 = vrot.slane %v2535_v47, %v2399_v15  ;;  %v424_v53 = vrot.slane %v2504_v17, %v2368_v6  ;;  %v436_v31 = vrot.slane %v2504_v17, %v2399_v15 }
 0x101   : > { %402 = vst [vmem:[#allocation2 + $0x168] sm:$0xf] %v398_v27  ;;  %1241 = vst [vmem:[#allocation2 + $0x10] sm:$0xf] %v1237_v35  ;;  %v350_v41 = vrot.slane %v342_v38, 4  ;;  %v1202_v42 = vrot.slane %v1194_v39, 4  ;;  %v272_v43 = vsel %vm270_vm9, %v2693_v40, %v2691_v0  ;;  %v1259_v46 = vrot.slane %v2512_v33, %v2397_v14 }
 0x102   : > { %v299_v56 = vmul.f32 %v288_v24, %v272_v43  ;;  %v1164_v20 = vmul.f32 %v1150_v30, %v272_v43  ;;  %v1263_v54 = vrot.slane %v2512_v33, %v2399_v15  ;;  %v1107_v59 = vrot.slane %v2703_v45, %v2370_v7 }
 0x103   : > { %358 = vst [vmem:[#allocation2 + $0x1b0] sm:$0xf0] %v350_v41  ;;  %1210 = vst [vmem:[#allocation2 + $0x40] sm:$0xf0] %v1202_v42  ;;  %v1103_v22 = vrot.slane %v2703_v45, %v2368_v6  ;;  %v284_v24 = vrot.slane %v2671_v12, %v2370_v7  ;;  %v1146_v30 = vrot.slane %v2673_v36, %v2368_v6 }
 0x104   : > { %v1519_v57 = vld [vmem:[#allocation2 + $0x170] sm:$0xff]  ;;  %v1518_v32 = vld [vmem:[#allocation2 + $0x88] sm:$0xff]  ;;  %303 = vst [vmem:[#allocation2 + $0xd8] sm:$0xf] %v299_v56  ;;  %1168 = vst [vmem:[#allocation2 + $0xa8] sm:$0xf] %v1164_v20  ;;  %v468_v55 = vpop.permute.xlu1 %467  ;;  %v412_v47 = vpop.permute.xlu0 %411  ;;  %v380_v28 = vrot.slane %v2611_v62, %v2368_v6 }
 0x105   : > { %1618 = vmatprep.subr.mxu1 %v1519_v57  ;;  %v470_v17 = vsel %vm469_vm6, %v2550_v63, %v468_v55  ;;  %v473_v60 = vsel %vm469_vm6, %v468_v55, %v2595_v21  ;;  %v414_v33 = vsel %vm413_vm5, %v2537_v50, %v412_v47  ;;  %v417_v61 = vsel %vm413_vm5, %v412_v47, %v2597_v25  ;;  %v2760_v56 = vld [vmem:[#allocation6 + $0x27] ss:$8 sm:$0xf] }
 0x106   : > { %1619 = vmatpush1.msra.mxu1 %v1518_v32  ;;  %v497_v2 = vmul.f32 %v480_v10, %v473_v60  ;;  %v500_v3 = vmul.f32 %v492_v44, %v470_v17  ;;  %v1313_v1 = vmul.f32 %v1302_v26, %v470_v17  ;;  %v1314_v4 = vmul.f32 %v1306_v52, %v473_v60 }
 0x107   : > { %v441_v5 = vmul.f32 %v424_v53, %v417_v61  ;;  %v444_v8 = vmul.f32 %v436_v31, %v414_v33  ;;  %v1270_v63 = vmul.f32 %v1259_v46, %v414_v33  ;;  %v1271_v11 = vmul.f32 %v1263_v54, %v417_v61 }
 0x108   : > { %501 = vst [vmem:[#allocation2 + $0x180] sm:$0xf] %v497_v2  ;;  %504 = vst [vmem:[#allocation2 + $0x98] sm:$0xf] %v500_v3  ;;  %v2732_v21 = vpop.permute.xlu1 %1088  ;;  %v1508_v50 = vld [vmem:[#allocation2 + $0x10] sm:$0xff]  ;;  %v1087_v37 = vpop.permute.xlu0 %1086  ;;  %v392_v10 = vrot.slane %v2611_v62, %v2399_v15  ;;  %v1228_v44 = vrot.slane %v2613_v9, %v2397_v14  ;;  %v1232_v62 = vrot.slane %v2613_v9, %v2399_v15 }
 0x109   : > { %1317 = vst [vmem:[#allocation2 + $0xa0] sm:$0xf] %v1313_v1  ;;  %1318 = vst [vmem:[#allocation2 + $0x158] sm:$0xf] %v1314_v4  ;;  %v449_v16 = vrot.slane %v441_v5, 4  ;;  %v452_v19 = vrot.slane %v444_v8, 4  ;;  %1552 = vmatpush1.msra.mxu0 %v1508_v50  ;;  %v1094_v29 = vsel %vm1092_vm10, %v1087_v37, %v2732_v21  ;;  %v324_v53 = vrot.slane %v2591_v48, %v2368_v6 }
 0x10a   : > { %v1278_v25 = vrot.slane %v1270_v63, 4  ;;  %v1279_v23 = vrot.slane %v1271_v11, 4  ;;  %v1121_v27 = vmul.f32 %v1107_v59, %v1094_v29  ;;  %v336_v31 = vrot.slane %v2591_v48, %v2399_v15  ;;  %v2787_v5 = vld [vmem:[#allocation6 + $0x40] ss:$8 sm:$0xf] }
 0x10b   : > { %457 = vst [vmem:[#allocation2 + $0x50] sm:$0xf0] %v449_v16  ;;  %460 = vst [vmem:[#allocation2 + $0x48] sm:$0xf0] %v452_v19  ;;  %v1505_v35 = vld [vmem:[#allocation2 + $0xa8] sm:$0xff]  ;;  %v1189_v46 = vrot.slane %v2593_v49, %v2399_v15  ;;  %v1007_v47 = vrot.slane %v2760_v56, %v2370_v7 }
 0x10c   : > { %1286 = vst [vmem:[#allocation2 + $0x160] sm:$0xf0] %v1278_v25  ;;  %1287 = vst [vmem:[#allocation2 + $0x20] sm:$0xf0] %v1279_v23  ;;  %v2743_v38 = vpop.permute.xlu1 %1084  ;;  %1553 = vmatprep.subr.mxu0 %v1505_v35  ;;  %v2745_v39 = vpop.permute.xlu0 %260  ;;  %v1129_v41 = vrot.slane %v1121_v27, 4  ;;  %v1003_v27 = vrot.slane %v2760_v56, %v2368_v6 }
 0x10d   : > { %v1095_v42 = vsel %vm1092_vm10, %v2743_v38, %v1087_v37  ;;  %v273_v43 = vsel %vm270_vm9, %v2745_v39, %v2693_v40  ;;  %v1185_v40 = vrot.slane %v2593_v49, %v2397_v14  ;;  %v1063_v37 = vrot.slane %v2787_v5, %v2370_v7 }
 0x10e   : > { %v1120_v20 = vmul.f32 %v1103_v22, %v1095_v42  ;;  %v298_v26 = vmul.f32 %v284_v24, %v273_v43  ;;  %v1163_v52 = vmul.f32 %v1146_v30, %v273_v43  ;;  %1137 = vst [vmem:[#allocation2 + $0x68] sm:$0xf0] %v1129_v41  ;;  %v1059_v30 = vrot.slane %v2787_v5, %v2368_v6 }
 0x110   : > { %v1515_v57 = vld [vmem:[#allocation2 + $0x158] sm:$0xff]  ;;  %v1514_v54 = vld [vmem:[#allocation2 + $0xa0] sm:$0xff]  ;;  %v1128_v32 = vrot.slane %v1120_v20, 4  ;;  %302 = vst [vmem:[#allocation2 + $0x1b0] sm:$0xf] %v298_v26  ;;  %v368_v55 = vpop.permute.xlu1 %367  ;;  %v312_v9 = vpop.permute.xlu0 %311  ;;  %v292_v20 = vrot.slane %v2671_v12, %v2399_v15 }
 0x111   : > { %1167 = vst [vmem:[#allocation2 + $0x40] sm:$0xf] %v1163_v52  ;;  %1620 = vmatprep.subr.mxu1 %v1515_v57  ;;  %v370_v48 = vsel %vm369_vm8, %v2629_v34, %v368_v55  ;;  %v373_v49 = vsel %vm369_vm8, %v368_v55, %v2675_v58  ;;  %v314_v59 = vsel %vm313_vm7, %v2615_v51, %v312_v9 }
 0x112   : > { %v317_v17 = vsel %vm313_vm7, %v312_v9, %v2677_v13  ;;  %1621 = vmatpush1.msra.mxu1 %v1514_v54  ;;  %1136 = vst [vmem:[#allocation2] sm:$0xf0] %v1128_v32  ;;  %v397_v60 = vmul.f32 %v380_v28, %v373_v49  ;;  %v400_v33 = vmul.f32 %v392_v10, %v370_v48 }
 0x113   : > { %v1239_v61 = vmul.f32 %v1228_v44, %v370_v48  ;;  %v1240_v2 = vmul.f32 %v1232_v62, %v373_v49  ;;  %v341_v3 = vmul.f32 %v324_v53, %v317_v17  ;;  %v344_v34 = vmul.f32 %v336_v31, %v314_v59  ;;  %v2824_v53 = vld [vmem:[#allocation6 + $0x26] ss:$8 sm:$0xf] }
 0x114   : > { %v1196_v1 = vmul.f32 %v1185_v40, %v314_v59  ;;  %v1197_v4 = vmul.f32 %v1189_v46, %v317_v17  ;;  %401 = vst [vmem:[#allocation2 + $0x50] sm:$0xf] %v397_v60  ;;  %404 = vst [vmem:[#allocation2 + $0x48] sm:$0xf] %v400_v33  ;;  %v2789_v51 = vpop.permute.xlu1 %988  ;;  %v987_v58 = vpop.permute.xlu0 %986  ;;  %v280_v44 = vrot.slane %v2671_v12, %v2368_v6 }
 0x115   : > { %1243 = vst [vmem:[#allocation2 + $0x160] sm:$0xf] %v1239_v61  ;;  %1244 = vst [vmem:[#allocation2 + $0x20] sm:$0xf] %v1240_v2  ;;  %v349_v13 = vrot.slane %v341_v3, 4  ;;  %v352_v8 = vrot.slane %v344_v34, 4  ;;  %v994_v50 = vsel %vm992_vm11, %v987_v58, %v2789_v51  ;;  %v1154_v62 = vrot.slane %v2673_v36, %v2397_v14 }
 0x116   : > { %v1204_v63 = vrot.slane %v1196_v1, 4  ;;  %v1205_v11 = vrot.slane %v1197_v4, 4  ;;  %v1021_v16 = vmul.f32 %v1007_v47, %v994_v50  ;;  %v1158_v57 = vrot.slane %v2673_v36, %v2399_v15  ;;  %v2852_v1 = vld [vmem:[#allocation6 + $0x23] ss:$8 sm:$0xf] }
 0x117   : > { %357 = vst [vmem:[#allocation2 + $0xb0] sm:$0xf0] %v349_v13  ;;  %360 = vst [vmem:[#allocation2 + $0x18] sm:$0xf0] %v352_v8  ;;  %v1111_v54 = vrot.slane %v2703_v45, %v2397_v14  ;;  %v1115_v12 = vrot.slane %v2703_v45, %v2399_v15  ;;  %v963_v55 = vrot.slane %v2824_v53, %v2370_v7 }
 0x118   : > { %1212 = vst [vmem:[#allocation2 + $0xd0] sm:$0xf0] %v1204_v63  ;;  %1213 = vst [vmem:[#allocation2 + $0x1a0] sm:$0xf0] %v1205_v11  ;;  %v1504_v19 = vld [vmem:[#allocation2 + $0x40] sm:$0xff]  ;;  %v2797_v25 = vpop.permute.xlu1 %1044  ;;  %v1043_v23 = vpop.permute.xlu0 %1042  ;;  %v1029_v29 = vrot.slane %v1021_v16, 4  ;;  %v959_v3 = vrot.slane %v2824_v53, %v2368_v6  ;;  %v828_v63 = vrot.slane %v2852_v1, %v2370_v7 }
 0x119   : > { %1554 = vmatpush1.msra.mxu0 %v1504_v19  ;;  %v1050_v22 = vsel %vm1048_vm12, %v1043_v23, %v2797_v25 }
 0x11a   : > { %v1077_v24 = vmul.f32 %v1063_v37, %v1050_v22  ;;  %1037 = vst [vmem:[#allocation2 + $0xc0] sm:$0xf0] %v1029_v29  ;;  %v2862_v37 = vld [vmem:[#allocation6 + $0x24] ss:$8 sm:$0xf]  ;;  %v1011_v29 = vrot.slane %v2760_v56, %v2397_v14 }
 0x11c   : > { %v1511_v35 = vld [vmem:[#allocation2 + $0x20] sm:$0xff]  ;;  %1081 = vst [vmem:[#allocation2 + $0x68] sm:$0xf] %v1077_v24  ;;  %v2806_v10 = vpop.permute.xlu1 %1040  ;;  %v2808_v41 = vpop.permute.xlu0 %984  ;;  %v1015_v24 = vrot.slane %v2760_v56, %v2399_v15 }
 0x11d   : > { %v1510_v28 = vld [vmem:[#allocation2 + $0x160] sm:$0xff]  ;;  %1622 = vmatprep.subr.mxu1 %v1511_v35  ;;  %v1051_v42 = vsel %vm1048_vm12, %v2806_v10, %v1043_v23  ;;  %v995_v43 = vsel %vm992_vm11, %v2808_v41, %v987_v58 }
 0x11e   : > { %1623 = vmatpush1.msra.mxu1 %v1510_v28  ;;  %v1076_v26 = vmul.f32 %v1059_v30, %v1051_v42  ;;  %v1020_v52 = vmul.f32 %v1003_v27, %v995_v43  ;;  %v884_v30 = vrot.slane %v2862_v37, %v2370_v7  ;;  %v824_v43 = vrot.slane %v2852_v1, %v2368_v6 }
 0x120   : > { %1080 = vst [vmem:[#allocation2] sm:$0xf] %v1076_v26  ;;  %v1028_v31 = vrot.slane %v1020_v52, 4  ;;  %v943_v40 = vpop.permute.xlu1 %942  ;;  %v267_v46 = vpop.permute.xlu0 %266  ;;  %v1067_v26 = vrot.slane %v2787_v5, %v2397_v14 }
 0x121   : > { %v271_v32 = vsel %vm270_vm9, %v2691_v0, %v267_v46  ;;  %v274_v36 = vsel %vm270_vm9, %v267_v46, %v2745_v39 }
 0x122   : > { %1036 = vst [vmem:[#allocation2 + $0x90] sm:$0xf0] %v1028_v31  ;;  %v297_v9 = vmul.f32 %v280_v44, %v274_v36  ;;  %v300_v47 = vmul.f32 %v292_v20, %v271_v32  ;;  %v1165_v48 = vmul.f32 %v1154_v62, %v271_v32  ;;  %v1166_v49 = vmul.f32 %v1158_v57, %v274_v36 }
 0x123   : > { %v1501_v59 = vld [vmem:[#allocation2 + $0x68] sm:$0xff]  ;;  %v1071_v31 = vrot.slane %v2787_v5, %v2399_v15 }
 0x124   : > { %301 = vst [vmem:[#allocation2 + $0xb0] sm:$0xf] %v297_v9  ;;  %304 = vst [vmem:[#allocation2 + $0x18] sm:$0xf] %v300_v47  ;;  %v1091_v0 = vpop.permute.xlu1 %1090  ;;  %1555 = vmatprep.subr.mxu0 %v1501_v59  ;;  %v2839_v45 = vpop.permute.xlu0 %944  ;;  %v880_v47 = vrot.slane %v2862_v37, %v2368_v6 }
 0x125   : > { %1169 = vst [vmem:[#allocation2 + $0xd0] sm:$0xf] %v1165_v48  ;;  %1170 = vst [vmem:[#allocation2 + $0x1a0] sm:$0xf] %v1166_v49  ;;  %v1093_v39 = vsel %vm1092_vm10, %v2732_v21, %v1091_v0  ;;  %v1096_v17 = vsel %vm1092_vm10, %v1091_v0, %v2743_v38  ;;  %v950_v60 = vsel %vm948_vm13, %v943_v40, %v2839_v45 }
 0x126   : > { %v1122_v33 = vmul.f32 %v1111_v54, %v1093_v39  ;;  %v1123_v61 = vmul.f32 %v1115_v12, %v1096_v17  ;;  %v977_v2 = vmul.f32 %v963_v55, %v950_v60  ;;  %v2906_v48 = vld [vmem:[#allocation6 + $0x21] ss:$8 sm:$0xf]  ;;  %v2913_v60 = vld [vmem:[#allocation6 + $0x22] ss:$8 sm:$0xf] }
 0x127   : > { %v1500_v34 = vld [vmem:[#allocation2] sm:$0xff]  ;;  %v728_v39 = vrot.slane %v2906_v48, %v2370_v7 }
 0x128   : > { %v1130_v4 = vrot.slane %v1122_v33, 4  ;;  %v1131_v58 = vrot.slane %v1123_v61, 4  ;;  %981 = vst [vmem:[#allocation2 + $0xc0] sm:$0xf] %v977_v2  ;;  %v806_v21 = vpop.permute.xlu1 %805  ;;  %1556 = vmatpush1.msra.mxu0 %v1500_v34  ;;  %v2854_v13 = vpop.permute.xlu0 %940 }
 0x129   : > { %v951_v38 = vsel %vm948_vm13, %v2854_v13, %v943_v40 }
 0x12a   : > { %1138 = vst [vmem:[#allocation2 + $0x148] sm:$0xf0] %v1130_v4  ;;  %1139 = vst [vmem:[#allocation2 + $0x8] sm:$0xf0] %v1131_v58  ;;  %v976_v8 = vmul.f32 %v959_v3, %v951_v38  ;;  %v967_v3 = vrot.slane %v2824_v53, %v2397_v14  ;;  %v971_v4 = vrot.slane %v2824_v53, %v2399_v15 }
 0x12b   : > { %v784_v58 = vrot.slane %v2913_v60, %v2370_v7 }
 0x12c   : > { %v1507_v11 = vld [vmem:[#allocation2 + $0x1a0] sm:$0xff]  ;;  %v1506_v50 = vld [vmem:[#allocation2 + $0xd0] sm:$0xff]  ;;  %980 = vst [vmem:[#allocation2 + $0x90] sm:$0xf] %v976_v8  ;;  %v862_v16 = vpop.permute.xlu1 %861  ;;  %v2864_v19 = vpop.permute.xlu0 %807 }
 0x12d   : > { %1624 = vmatprep.subr.mxu1 %v1507_v11  ;;  %v816_v23 = vsel %vm813_vm14, %v806_v21, %v2864_v19 }
 0x12e   : > { %1625 = vmatpush1.msra.mxu1 %v1506_v50  ;;  %v842_v22 = vmul.f32 %v828_v63, %v816_v23 }
 0x12f   : > { %v1497_v27 = vld [vmem:[#allocation2 + $0xc0] sm:$0xff] }
 0x130   : > { %v850_v35 = vrot.slane %v842_v22, 4  ;;  %v991_v28 = vpop.permute.xlu1 %990  ;;  %1557 = vmatprep.subr.mxu0 %v1497_v27  ;;  %v2876_v42 = vpop.permute.xlu0 %863  ;;  %v780_v22 = vrot.slane %v2913_v60, %v2368_v6 }
 0x131   : > { %v993_v44 = vsel %vm992_vm11, %v2789_v51, %v991_v28  ;;  %v996_v56 = vsel %vm992_vm11, %v991_v28, %v2808_v41  ;;  %v872_v20 = vsel %vm869_vm15, %v862_v16, %v2876_v42 }
 0x132   : > { %858 = vst [vmem:[#allocation2 + $0x1a8] sm:$0xf0] %v850_v35  ;;  %v1022_v52 = vmul.f32 %v1011_v29, %v993_v44  ;;  %v1023_v62 = vmul.f32 %v1015_v24, %v996_v56  ;;  %v898_v57 = vmul.f32 %v884_v30, %v872_v20  ;;  %v724_v30 = vrot.slane %v2906_v48, %v2368_v6 }
 0x133   : > { %v1496_v40 = vld [vmem:[#allocation2 + $0x90] sm:$0xff]  ;;  %v892_v44 = vrot.slane %v2862_v37, %v2399_v15  ;;  %v832_v56 = vrot.slane %v2852_v1, %v2397_v14  ;;  %v836_v20 = vrot.slane %v2852_v1, %v2399_v15 }
 0x134   : > { %v1030_v51 = vrot.slane %v1022_v52, 4  ;;  %v1031_v46 = vrot.slane %v1023_v62, 4  ;;  %902 = vst [vmem:[#allocation2 + $0xf8] sm:$0xf] %v898_v57  ;;  %v2893_v54 = vpop.permute.xlu1 %811  ;;  %1558 = vmatpush1.msra.mxu0 %v1496_v40  ;;  %v1047_v41 = vpop.permute.xlu0 %1046  ;;  %v788_v52 = vrot.slane %v2913_v60, %v2397_v14  ;;  %v792_v40 = vrot.slane %v2913_v60, %v2399_v15 }
 0x135   : > { %v817_v12 = vsel %vm813_vm14, %v2893_v54, %v806_v21  ;;  %v1049_v32 = vsel %vm1048_vm12, %v2797_v25, %v1047_v41  ;;  %v1052_v5 = vsel %vm1048_vm12, %v1047_v41, %v2806_v10 }
 0x136   : > { %1038 = vst [vmem:[#allocation2 + $0x178] sm:$0xf0] %v1030_v51  ;;  %1039 = vst [vmem:[#allocation2 + $0xc8] sm:$0xf0] %v1031_v46  ;;  %v841_v36 = vmul.f32 %v824_v43, %v817_v12  ;;  %v1078_v55 = vmul.f32 %v1067_v26, %v1049_v32  ;;  %v1079_v9 = vmul.f32 %v1071_v31, %v1052_v5 }
 0x137   : > { %v888_v43 = vrot.slane %v2862_v37, %v2397_v14 }
 0x138   : > { %v849_v49 = vrot.slane %v841_v36, 4  ;;  %1082 = vst [vmem:[#allocation2 + $0x148] sm:$0xf] %v1078_v55  ;;  %1083 = vst [vmem:[#allocation2 + $0x8] sm:$0xf] %v1079_v9  ;;  %v706_v59 = vpop.permute.xlu1 %705  ;;  %v868_v0 = vpop.permute.xlu0 %867  ;;  %v736_v55 = vrot.slane %v2906_v48, %v2399_v15 }
 0x139   : > { %v873_v25 = vsel %vm869_vm15, %v868_v0, %v862_v16 }
 0x13a   : > { %857 = vst [vmem:[#allocation2 + $0x80] sm:$0xf0] %v849_v49  ;;  %v897_v10 = vmul.f32 %v880_v47, %v873_v25 }
 0x13b   : > { %v1493_v17 = vld [vmem:[#allocation2 + $0xf8] sm:$0xff] }
 0x13c   : > { %901 = vst [vmem:[#allocation2 + $0xe8] sm:$0xf] %v897_v10  ;;  %v762_v33 = vpop.permute.xlu1 %761  ;;  %1559 = vmatprep.subr.mxu0 %v1493_v17  ;;  %v2915_v61 = vpop.permute.xlu0 %707 }
 0x13d   : > { %v716_v2 = vsel %vm713_vm0, %v706_v59, %v2915_v61 }
 0x13e   : > { %v742_v34 = vmul.f32 %v728_v39, %v716_v2 }
 0x13f   : > { %v1503_v21 = vld [vmem:[#allocation2 + $0x8] sm:$0xff] }
 0x140   : > { %v1502_v38 = vld [vmem:[#allocation2 + $0x148] sm:$0xff]  ;;  %v750_v8 = vrot.slane %v742_v34, 4  ;;  %v947_v63 = vpop.permute.xlu1 %946  ;;  %1626 = vmatprep.subr.mxu1 %v1503_v21  ;;  %v764_v11 = vpop.permute.xlu0 %763  ;;  %v1481_v34 = vld [vmem:[#allocation2 + $0x150] sm:$0xff]  ;;  %v1476_v21 = vld [vmem:[#allocation2 + $0x180] sm:$0xff] }
 0x141   : > { %v949_v50 = vsel %vm948_vm13, %v2839_v45, %v947_v63  ;;  %v952_v16 = vsel %vm948_vm13, %v947_v63, %v2854_v13  ;;  %v772_v53 = vsel %vm769_vm1, %v762_v33, %v764_v11  ;;  %1627 = vmatpush1.msra.mxu1 %v1502_v38  ;;  %v1473_v38 = vld [vmem:[#allocation2 + $0x168] sm:$0xff] }
 0x142   : > { %758 = vst [vmem:[#allocation2 + $0x188] sm:$0xf0] %v750_v8  ;;  %v978_v7 = vmul.f32 %v967_v3, %v949_v50  ;;  %v979_v23 = vmul.f32 %v971_v4, %v952_v16  ;;  %v798_v29 = vmul.f32 %v784_v58, %v772_v53  ;;  %v1477_v58 = vld [vmem:[#allocation2 + $0x110] sm:$0xff]  ;;  %v1467_v16 = vld [vmem:[#allocation8] sm:$0xf] }
 0x143   : > { %v1492_v24 = vld [vmem:[#allocation2 + $0xe8] sm:$0xff]  ;;  %v1469_v50 = vld [vmem:[#allocation2 + $0x1b0] sm:$0xff] }
 0x144   : > { %982 = vst [vmem:[#allocation2 + $0x178] sm:$0xf] %v978_v7  ;;  %983 = vst [vmem:[#allocation2 + $0xc8] sm:$0xf] %v979_v23  ;;  %v768_v45 = vpop.permute.xlu1 %767  ;;  %1560 = vmatpush1.msra.mxu0 %v1492_v24  ;;  %v1468_v53 = vld [vmem:[#allocation2 + $0xb0] sm:$0xff]  ;;  %v1479_v24 = vld [vmem:[#allocation2 + $0x98] sm:$0xff] }
 0x145   : > { %802 = vst [vmem:[#allocation2 + $0x1a8] sm:$0xf] %v798_v29  ;;  %v773_v13 = vsel %vm769_vm1, %v768_v45, %v762_v33  ;;  %v712_v27 = vpop.permute.xlu0 %711  ;;  %v1483_v29 = vld [vmem:[#allocation2 + $0x60] sm:$0xff] }
 0x146   : > { %v797_v35 = vmul.f32 %v780_v22, %v773_v13  ;;  %v717_v28 = vsel %vm713_vm0, %v712_v27, %v706_v59  ;;  %v1482_v22 = vld [vmem:[#allocation2 + $0x108] sm:$0xff]  ;;  %v1474_v13 = vld [vmem:[#allocation2 + $0x130] sm:$0xff] }
 0x147   : > { %v741_v6 = vmul.f32 %v724_v30, %v717_v28  ;;  %v1478_v30 = vld [vmem:[#allocation2 + $0x118] sm:$0xff] }
 0x148   : > { %801 = vst [vmem:[#allocation2 + $0x80] sm:$0xf] %v797_v35  ;;  %v866_v26 = vpop.permute.xlu1 %865  ;;  %v1470_v35 = vld [vmem:[#allocation2 + $0xd8] sm:$0xff] }
 0x149   : > { %v749_v62 = vrot.slane %v741_v6, 4  ;;  %v870_v57 = vsel %vm869_vm15, %v866_v26, %v868_v0  ;;  %v871_v37 = vsel %vm869_vm15, %v2876_v42, %v866_v26  ;;  %v810_v31 = vpop.permute.xlu0 %809  ;;  %v732_v42 = vrot.slane %v2906_v48, %v2397_v14  ;;  %v1485_v60 = vld [vmem:[#allocation2 + $0x188] sm:$0xff] }
 0x14a   : > { %v899_v51 = vmul.f32 %v888_v43, %v871_v37  ;;  %v900_v46 = vmul.f32 %v892_v44, %v870_v57  ;;  %v814_v1 = vsel %vm813_vm14, %v810_v31, %v2893_v54  ;;  %v815_v41 = vsel %vm813_vm14, %v2864_v19, %v810_v31 }
 0x14b   : > { %757 = vst [vmem:[#allocation2 + $0xe0] sm:$0xf0] %v749_v62  ;;  %v843_v12 = vmul.f32 %v832_v56, %v815_v41  ;;  %v844_v32 = vmul.f32 %v836_v20, %v814_v1  ;;  %v1499_v36 = vld [vmem:[#allocation2 + $0xc8] sm:$0xff]  ;;  %v1498_v9 = vld [vmem:[#allocation2 + $0x178] sm:$0xff] }
 0x14c   : > { %v1489_v5 = vld [vmem:[#allocation2 + $0x1a8] sm:$0xff]  ;;  %903 = vst [vmem:[#allocation2 + $0x190] sm:$0xf] %v899_v51  ;;  %904 = vst [vmem:[#allocation2 + $0xb8] sm:$0xf] %v900_v46  ;;  %v766_v47 = vpop.permute.xlu1 %765  ;;  %1628 = vmatprep.subr.mxu1 %v1499_v36 }
 0x14d   : > { %1561 = vmatprep.subr.mxu0 %v1489_v5  ;;  %v851_v54 = vrot.slane %v843_v12, 4  ;;  %v852_v49 = vrot.slane %v844_v32, 4  ;;  %v770_v19 = vsel %vm769_vm1, %v766_v47, %v768_v45  ;;  %v771_v59 = vsel %vm769_vm1, %v764_v11, %v766_v47  ;;  %v710_v0 = vpop.permute.xlu0 %709  ;;  %1629 = vmatpush1.msra.mxu1 %v1498_v9  ;;  %v1472_v11 = vld [vmem:[#allocation2 + $0x50] sm:$0xff]  ;;  %v1475_v45 = vld [vmem:[#allocation2 + $0x48] sm:$0xff] }
 0x14e   : > { %v799_v14 = vmul.f32 %v788_v52, %v771_v59  ;;  %v800_v25 = vmul.f32 %v792_v40, %v770_v19  ;;  %v714_v15 = vsel %vm713_vm0, %v710_v0, %v712_v27  ;;  %v715_v48 = vsel %vm713_vm0, %v2915_v61, %v710_v0  ;;  %v1480_v61 = vld [vmem:[#allocation2 + $0x120] sm:$0xff]  ;;  %v1471_v27 = vld [vmem:[#allocation2 + $0x18] sm:$0xff] }
 0x14f   : > { %859 = vst [vmem:[#allocation2 + $0x1b8] sm:$0xf0] %v851_v54  ;;  %860 = vst [vmem:[#allocation2 + $0x28] sm:$0xf0] %v852_v49  ;;  %v743_v10 = vmul.f32 %v732_v42, %v715_v48  ;;  %v744_v39 = vmul.f32 %v736_v55, %v714_v15  ;;  %v1488_v17 = vld [vmem:[#allocation2 + $0x80] sm:$0xff] }
 0x150   : > { %803 = vst [vmem:[#allocation2 + $0x1b8] sm:$0xf] %v799_v14  ;;  %804 = vst [vmem:[#allocation2 + $0x28] sm:$0xf] %v800_v25  ;;  %1562 = vmatpush1.msra.mxu0 %v1488_v17 }
 0x151   : > { %v751_v33 = vrot.slane %v743_v10, 4  ;;  %v752_v2 = vrot.slane %v744_v39, 4  ;;  %1563 = vmatprep.subr.mxu0 %v1485_v60 }
 0x152   : > { %v1484_v3 = vld [vmem:[#allocation2 + $0xe0] sm:$0xff] }
 0x153   : > { %759 = vst [vmem:[#allocation2 + $0x138] sm:$0xf0] %v751_v33  ;;  %760 = vst [vmem:[#allocation2 + $0x140] sm:$0xf0] %v752_v2  ;;  %1564 = vmatpush1.msra.mxu0 %v1484_v3  ;;  %v1495_v4 = vld [vmem:[#allocation2 + $0xb8] sm:$0xff]  ;;  %v1494_v18 = vld [vmem:[#allocation2 + $0x190] sm:$0xff] }
 0x154   : > { %1565 = vmatprep.subr.mxu0 %v1481_v34  ;;  %1630 = vmatprep.subr.mxu1 %v1495_v4 }
 0x155   : > { %1566 = vmatpush1.msra.mxu0 %v1480_v61  ;;  %1631 = vmatpush1.msra.mxu1 %v1494_v18 }
 0x156   : > { %1567 = vmatprep.subr.mxu0 %v1477_v58 }
 0x157   : > { %1568 = vmatpush1.msra.mxu0 %v1476_v21  ;;  %v1491_v8 = vld [vmem:[#allocation2 + $0x28] sm:$0xff]  ;;  %v1490_v63 = vld [vmem:[#allocation2 + $0x1b8] sm:$0xff] }
 0x158   : > { %1569 = vmatprep.subr.mxu0 %v1473_v38  ;;  %1632 = vmatprep.subr.mxu1 %v1491_v8 }
 0x159   : > { %1570 = vmatpush1.msra.mxu0 %v1472_v11  ;;  %1633 = vmatpush1.msra.mxu1 %v1490_v63 }
 0x15a   : > { %1571 = vmatprep.subr.mxu0 %v1469_v50  ;;  %v1487_v7 = vld [vmem:[#allocation2 + $0x140] sm:$0xff]  ;;  %v1486_v23 = vld [vmem:[#allocation2 + $0x138] sm:$0xff] }
 0x15b   : > { %1572 = vmatpush1.msra.mxu0 %v1468_v53  ;;  %1634 = vmatprep.subr.mxu1 %v1487_v7 }
 0x15c   : > { %1635 = vmatpush1.msra.mxu1 %v1486_v23  ;;  %1875 = vmatmul.mubr.msk.f32.vlgmr.msra.gmra.mxu0 %vm1524_vm2, %v1467_v16 }
 0x15d   : > { %1636 = vmatprep.subr.mxu1 %v1483_v29 }
 0x15e   : > { %1637 = vmatpush1.msra.mxu1 %v1482_v22 }
 0x15f   : > { %1638 = vmatprep.subr.mxu1 %v1479_v24 }
 0x160   : > { %1639 = vmatpush1.msra.mxu1 %v1478_v30 }
 0x161   : > { %1640 = vmatprep.subr.mxu1 %v1475_v45 }
 0x162   : > { %1641 = vmatpush1.msra.mxu1 %v1474_v13 }
 0x163   : > { %1642 = vmatprep.subr.mxu1 %v1471_v27 }
 0x164   : > { %1643 = vmatpush1.msra.mxu1 %v1470_v35 }
 0x165   : > { %1878 = vmatmul.mubr.msk.f32.vlgmr.msra.gmra.mxu1 %vm1524_vm2, %v1467_v16 }
 0x21c   : > { %v1607_v28 = vpop.f32.mrf.mxu0 }
 0x21d   : > { %v1693_v6 = vsel %vm1528_vm4, %v1607_v28, 0.0 }
 0x21e   : > { %v1609_v43 = vpop.f32.mrf.mxu0 }
 0x21f   : > { %v1687_v44 = vcombine.low %v1607_v28, %v1609_v43  ;;  %v1694_v56 = vsel %vm1528_vm4, %v1609_v43, 0.0 }
 0x220   : > { %v1695_v20 = vadd.f32 %v1694_v56, %v1693_v6 }
 0x221   : > { %1691 = vst [vmem:[%s2983_s21] sm:$0xff] %v1687_v44 }
 0x225   : > { %v1678_v26 = vpop.f32.mrf.mxu1 }
 0x226   : > { %v1696_v52 = vsel %vm1528_vm4, %v1678_v26, 0.0 }
 0x227   : > { %v1680_v62 = vpop.f32.mrf.mxu1  ;;  %v1697_v57 = vadd.f32 %v1696_v52, %v1695_v20 }
 0x228   : > { %v1688_v37 = vcombine.low %v1678_v26, %v1680_v62  ;;  %v1698_v31 = vsel %vm1528_vm4, %v1680_v62, 0.0 }
 0x229   : > { %v1699_v40 = vadd.f32 %v1698_v31, %v1697_v57 }
 0x22a   : > { %1692 = vst [vmem:[%s2983_s21 + $0x8] sm:$0xff] %v1688_v37 }
 0x22b   : > { %1700 = vadd.xlane.f32.xlu0 %v1699_v40 }
 0x2b4   : > { %v1701_v51 = vpop.xlane.xlu0 %1700 }
 0x2b5   : > { %v1702_v46 = vmul.f32 0.001953125, %v1701_v51 }
 0x2b7   : > { %v1703_v1 = vsub.f32 %v1607_v28, %v1702_v46  ;;  %v1704_v41 = vsub.f32 %v1609_v43, %v1702_v46  ;;  %v1705_v12 = vsub.f32 %v1678_v26, %v1702_v46  ;;  %v1706_v32 = vsub.f32 %v1680_v62, %v1702_v46 }
 0x2b9   : > { %v1707_v5 = vmul.f32 %v1703_v1, %v1703_v1  ;;  %v1708_v36 = vmul.f32 %v1704_v41, %v1704_v41  ;;  %v1709_v42 = vmul.f32 %v1705_v12, %v1705_v12  ;;  %v1710_v55 = vmul.f32 %v1706_v32, %v1706_v32 }
 0x2bb   : > { %v1711_v9 = vsel %vm1528_vm4, %v1707_v5, 0.0  ;;  %v1712_v47 = vsel %vm1528_vm4, %v1708_v36, 0.0  ;;  %v1714_v49 = vsel %vm1528_vm4, %v1709_v42, 0.0  ;;  %v1716_v59 = vsel %vm1528_vm4, %v1710_v55, 0.0 }
 0x2bc   : > { %v1713_v54 = vadd.f32 %v1712_v47, %v1711_v9 }
 0x2be   : > { %v1715_v19 = vadd.f32 %v1714_v49, %v1713_v54 }
 0x2c0   : > { %v1717_v0 = vadd.f32 %v1716_v59, %v1715_v19 }
 0x2c2   : > { %1718 = vadd.xlane.f32.xlu1 %v1717_v0 }
 0x2c3   : > { %2068 = shalt.err (!%p2065_p9)
}
 0x2c4   : > { %s2069_s28 = scalar_lea.hbm %s1741_s12, 256  ;;  %s2073_s10 = scalar_lea.hbm %s3039_s3, 512 }
 0x2c5   : > { %p2070_p13 = scmp.ne.s32.totalorder %s1741_s12, %s2069_s28  ;;  %p2074_p4 = scmp.lt.s32.totalorder %s1741_s12, %s3039_s3 }
 0x2c6   : > { %p2075_p8 = scmp.lt.s32.totalorder %s2073_s10, %s2069_s28 }
 0x2c7   : > { %p2071_p5 = pnand %p2070_p13, %p3056_p0 }
 0x2c8   : > { %p2076_p3 = por %p2075_p8, %p2074_p4 }
 0x2c9   : > { %p2072_p10 = pneg %p2071_p5 }
 0x2cb   : > { %p2077_p11 = pnand %p2076_p3, %p2072_p10 }
 0x2cd   : > { %2080 = shalt.err (!%p2077_p11)
}
 0x2ce   : > { %1896 = dma.vmem_to_hbm [thread:$0]  (%p3056_p0), %s1744_s5, 256, %s1741_s12, %s1725_s13   ;;  %vm1720_vm3 = vcmask 7168   ;;  %vm1722_vm4 = vcmask 11264  }
 0x2cf   : > { %p248_p1 = scmp.lt.s32.totalorder %s2195_s19, 1 }
 0x2d1   : > { %s3064_s19 = smov (!%p248_p1, %s2195_s19), 1 }
 0x2d2   : > { %s1872_s21 = sshll.u32 %s3064_s19, 2 }
 0x2d3   : > { %s251_s7 = scalar_lea.vmem %s3040_s4, %s1872_s21 }
 0x34b   : > { %v1719_v14 = vpop.xlane.xlu1 %1718 }
 0x34c   : > { %v1721_v25 = vsel %vm1720_vm3, %v1701_v51, %v1719_v14 }
 0x34d   : > { %1723 = vst.msk [vmem:[%s251_s7] sm:$0xf] %vm1722_vm4, %v1721_v25 }
 0x34e PF: > { %s1758_s14 = sand.u32 1, %s2111_s15   ;;  %p3057_p2 = scmp.ne.s32.totalorder %s3046_s22, 0 }
 0x34f   : > { %p3058_p6 = scmp.ge.s32.totalorder %s2123_s18, 2  ;;  %s1759_s5 = scalar_lea.sflag [#allocation5], %s1758_s14 }
 0x351   : > { %p1910_p0 = pnand %p3058_p6, %p3057_p2 }
 0x353   : > { %p1911_p12 = pneg %p1910_p0 }
 0x355   : > { %2106 = dma.done.wait (%p1911_p12), %s1759_s5, 256  }
 0x356   : > { %2108 = vsyncadd (%p1911_p12), %s1759_s5, 4294967040  ;;  %p19_p7 = scmp.ge.s32.totalorder %s2246_s11, 4   ;;  %s3059_s15 = smov %s2115_s16 }
 0x357   : > { %s3060_s16 = smov %s2119_s17  ;;  %s3061_s17 = smov %s2262_s20 }
 0x358   : > { %s3062_s18 = smov %s2246_s11  ;;  %21 = sbr.rel (!%p19_p7) target bundleno = 6 (0x6), region = 123 }
 0x35d   :  { %1771 = vsyncpa [#allocation4], 1 }
 0x35e   :  { %1773 = vsyncpa [#allocation4 + $0x1], 1 }
 0x35f   :  { %1774 = vsyncpa [#allocation7], 1 }
 0x360   :  { %1775 = vsyncpa [#allocation5], 1 }
 0x361   :  { %1777 = vsyncpa [#allocation5 + $0x1], 1 }

</bundles_post_ra>
